<compile_context>
chip_gen: v5e
topology: v5e:2x2
jax: 0.10.0
libtpu: 0.0.40
codegen_flags: <defaults>
</compile_context>

<pallas_src>
import jax
import jax.numpy as jnp
from jax.experimental import pallas as pl
from jax.experimental.pallas import tpu as pltpu


def _round_up(a: int, b: int) -> int:
    return ((a + b - 1) // b) * b


def _pick_inter_tile(i_dim: int, target: int) -> int:
    """Largest multiple of 128 that divides i_dim and is <= target (else i_dim)."""
    if i_dim <= target:
        return i_dim
    t = (target // 128) * 128
    while t >= 128:
        if i_dim % t == 0:
            return t
        t -= 128
    return i_dim


def chameleon_mlp_kernel(x_ref, wg_ref, wu_ref, wd_ref, o_ref, acc_ref):
    """One (token-tile, intermediate-tile) grid step of the fused MLP."""
    k = pl.program_id(1)

    @pl.when(k == 0)
    def _init():
        acc_ref[...] = jnp.zeros_like(acc_ref)

    x = x_ref[...]                                                        # [tm, H]
    gate = jnp.dot(x, wg_ref[...], preferred_element_type=jnp.float32)    # [tm, ti]
    up = jnp.dot(x, wu_ref[...], preferred_element_type=jnp.float32)      # [tm, ti]
    # SiluAndMul in f32 (correct on all chips; sigmoid goes to the EUP slot).
    h = (gate * jax.nn.sigmoid(gate)) * up                                # [tm, ti] f32
    # Partial down projection, accumulated across the I (k) axis in f32.
    acc_ref[...] += jnp.dot(h.astype(wd_ref.dtype), wd_ref[...],
                            preferred_element_type=jnp.float32)           # [tm, H]

    @pl.when(k == pl.num_programs(1) - 1)
    def _writeback():
        o_ref[...] = acc_ref[...].astype(o_ref.dtype)


def _vmem_need(tm, H, ti, in_isz, w_isz, out_isz):
    """Double-buffered I/O tiles + f32 accumulator, in bytes."""
    return (2 * tm * H * in_isz            # x tile (resident, but budget 2x)
            + 2 * 2 * H * ti * w_isz       # gate + up weight tiles (2-buffered)
            + 2 * ti * H * w_isz           # down weight tile (2-buffered)
            + 2 * tm * H * out_isz         # output tile
            + tm * H * 4)                  # f32 accumulator scratch


def chameleon_mlp(x, w_gate_up, w_down, *, tm: int = 512, inter_tile: int = 512):
    """x: [T, H]; w_gate_up: [H, 2*I] (merged, [gate | up]); w_down: [I, H] -> [T, H]."""
    T, H = x.shape
    two_i = w_gate_up.shape[1]
    I = two_i // 2
    assert w_gate_up.shape == (H, 2 * I)
    assert w_down.shape == (I, H)
    assert I % 128 == 0, "intermediate_size must be a multiple of 128 (TPU lane width)"

    in_isz = x.dtype.itemsize
    w_isz = w_gate_up.dtype.itemsize
    out_isz = x.dtype.itemsize

    # Intermediate-dim tile (weight streaming granularity).
    ti = _pick_inter_tile(I, inter_tile)
    num_k = I // ti

    # Token tiling: big tiles amortize weight re-streaming (arithmetic intensity
    # = 2*tm/itemsize FLOP per weight byte), but stay inside a VMEM budget safe
    # for v7x (64 MiB physical).  Pad ragged T and slice the result back.
    vmem_budget = 48 * 1024 * 1024
    tm_eff = min(max(8, (tm // 8) * 8), _round_up(T, 8))
    while tm_eff > 64 and _vmem_need(tm_eff, H, ti, in_isz, w_isz, out_isz) > vmem_budget:
        tm_eff = max(64, (tm_eff // 2 // 8) * 8)

    T_pad = _round_up(T, tm_eff)
    if T_pad != T:
        x = jnp.pad(x, ((0, T_pad - T), (0, 0)))
    n_token_tiles = T_pad // tm_eff

    vmem_need = _vmem_need(tm_eff, H, ti, in_isz, w_isz, out_isz)
    vmem_limit = int(min(64 * 1024 * 1024,
                         max(32 * 1024 * 1024, int(1.4 * vmem_need))))

    cost = pl.CostEstimate(
        flops=6 * T_pad * H * I,                          # 2*T*H*2I + 2*T*I*H
        transcendentals=T_pad * I,                        # sigmoid
        bytes_accessed=int(T_pad * H * in_isz
                           + 3 * H * I * w_isz * n_token_tiles
                           + T_pad * H * out_isz),
    )

    grid = (n_token_tiles, num_k)
    out = pl.pallas_call(
        chameleon_mlp_kernel,
        out_shape=jax.ShapeDtypeStruct((T_pad, H), x.dtype),
        grid_spec=pltpu.PrefetchScalarGridSpec(
            num_scalar_prefetch=0,
            grid=grid,
            in_specs=[
                # x tile: resident across the k (reduction) axis.
                pl.BlockSpec((tm_eff, H), lambda i, k: (i, 0)),
                # gate columns of the merged [H, 2I] weight: block column k.
                pl.BlockSpec((H, ti), lambda i, k: (0, k)),
                # up columns of the merged weight: block column k + I//ti.
                pl.BlockSpec((H, ti), lambda i, k: (0, k + num_k)),
                # down-projection rows for this intermediate tile.
                pl.BlockSpec((ti, H), lambda i, k: (k, 0)),
            ],
            out_specs=pl.BlockSpec((tm_eff, H), lambda i, k: (i, 0)),
            scratch_shapes=[pltpu.VMEM((tm_eff, H), jnp.float32)],
        ),
        compiler_params=pltpu.CompilerParams(
            dimension_semantics=("parallel", "arbitrary"),
            vmem_limit_bytes=vmem_limit,
        ),
        cost_estimate=cost,
    )(x, w_gate_up, w_gate_up, w_down)

    return out[:T] if T_pad != T else out


def chameleon_mlp_ref(x, w_gate_up, w_down):
    """Pure-JAX reference matching the PyTorch forward (full-precision matmuls)."""
    hp = jax.lax.Precision.HIGHEST
    gate_up = jnp.dot(x, w_gate_up, precision=hp)
    I = w_down.shape[0]
    gate, up = gate_up[:, :I], gate_up[:, I:]
    h = jax.nn.silu(gate) * up
    return jnp.dot(h, w_down, precision=hp)


if __name__ == "__main__":
    # Small but TPU-aligned shapes (I multiple of 128); T is ragged on purpose.
    T, H, I = 24, 256, 1024

    key = jax.random.PRNGKey(0)
    kx, kgu, kd = jax.random.split(key, 3)
    x = jax.random.normal(kx, (T, H), dtype=jnp.float32)
    w_gate_up = jax.random.normal(kgu, (H, 2 * I), dtype=jnp.float32) * 0.02
    w_down = jax.random.normal(kd, (I, H), dtype=jnp.float32) * 0.02

    ref = chameleon_mlp_ref(x, w_gate_up, w_down)

    # 1) f32 path, default tiles (tm collapses to the token count).
    out = jax.block_until_ready(chameleon_mlp(x, w_gate_up, w_down))
    assert out.shape == (T, H)
    assert jnp.allclose(out, ref, atol=2e-3, rtol=2e-2), "f32 mismatch vs reference"

    # 2) exercise token padding + multiple token tiles (tm=16 -> pad 24 -> 32).
    out_pad = jax.block_until_ready(chameleon_mlp(x, w_gate_up, w_down, tm=16))
    assert out_pad.shape == (T, H)
    assert jnp.allclose(out_pad, ref, atol=2e-3, rtol=2e-2), "padded-T mismatch"

    # 3) bf16 operands (MXU-native on v6e/v7x), f32 accumulation inside kernel.
    xb = x.astype(jnp.bfloat16)
    wgub = w_gate_up.astype(jnp.bfloat16)
    wdb = w_down.astype(jnp.bfloat16)
    out_bf16 = jax.block_until_ready(chameleon_mlp(xb, wgub, wdb))
    ref_bf16 = chameleon_mlp_ref(xb.astype(jnp.float32),
                                 wgub.astype(jnp.float32),
                                 wdb.astype(jnp.float32))
    assert jnp.allclose(out_bf16.astype(jnp.float32), ref_bf16,
                        atol=2e-2, rtol=1e-1), "bf16 mismatch vs reference"

    # TODO(synk): tensor-parallel sharding / all-reduce of RowParallelLinear and
    # quant_config are not modeled; this is the single-shard unquantized MLP.
    print("KERNEL_OK")
</pallas_src>

<mosaic_0001>
module attributes {stable_mosaic.version = 11 : i64} {
  func.func @chameleon_mlp_kernel(%arg0: i32, %arg1: i32, %arg2: memref<24x256xf32, #tpu.memory_space<vmem>>, %arg3: memref<256x512xf32, #tpu.memory_space<vmem>>, %arg4: memref<256x512xf32, #tpu.memory_space<vmem>>, %arg5: memref<512x256xf32, #tpu.memory_space<vmem>>, %arg6: memref<24x256xf32, #tpu.memory_space<vmem>>, %arg7: memref<24x256xf32, #tpu.memory_space<vmem>>) attributes {dimension_semantics = [#tpu.dimension_semantics<parallel>, #tpu.dimension_semantics<arbitrary>], iteration_bounds = array<i64: 1, 2>, scalar_prefetch = 0 : i64, scratch_operands = 1 : i64, tpu.core_type = #tpu.core_type<tc>, window_params = [{transform_indices = @transform_0, window_bounds = array<i64: 24, 256>}, {transform_indices = @transform_1, window_bounds = array<i64: 256, 512>}, {transform_indices = @transform_2, window_bounds = array<i64: 256, 512>}, {transform_indices = @transform_3, window_bounds = array<i64: 512, 256>}, {transform_indices = @transform_4, window_bounds = array<i64: 24, 256>}]} {
    %c0_i32 = arith.constant 0 : i32
    %0 = arith.cmpi eq, %arg1, %c0_i32 : i32
    %1 = arith.extui %0 : i1 to i32
    %c0_i32_0 = arith.constant 0 : i32
    %2 = arith.cmpi ne, %1, %c0_i32_0 : i32
    scf.if %2 {
      %cst_16 = arith.constant 0.000000e+00 : f32
      %23 = vector.broadcast %cst_16 : f32 to vector<24x256xf32>
      %c0_17 = arith.constant 0 : index
      %c0_18 = arith.constant 0 : index
      %24 = vector.load %arg7[%c0_17, %c0_18] : memref<24x256xf32, #tpu.memory_space<vmem>>, vector<24x256xf32>
      tpu.vector_store %arg7[%c0_17, %c0_18], %23 {strides = array<i32>} : memref<24x256xf32, #tpu.memory_space<vmem>>, vector<24x256xf32>,
    } else {
    }
    %c0 = arith.constant 0 : index
    %c0_1 = arith.constant 0 : index
    %3 = vector.load %arg2[%c0, %c0_1] : memref<24x256xf32, #tpu.memory_space<vmem>>, vector<24x256xf32>
    %c0_2 = arith.constant 0 : index
    %c0_3 = arith.constant 0 : index
    %4 = vector.load %arg3[%c0_2, %c0_3] : memref<256x512xf32, #tpu.memory_space<vmem>>, vector<256x512xf32>
    %cst = arith.constant dense<0.000000e+00> : vector<24x512xf32>
    %5 = tpu.matmul %3, %4, %cst {dimension_numbers = #tpu.dot_dimension_numbers<[1], [0], [0], [1], [0, 0, 1, 1], [], []>} : vector<24x256xf32>, vector<256x512xf32>, vector<24x512xf32> -> vector<24x512xf32>
    %c0_4 = arith.constant 0 : index
    %c0_5 = arith.constant 0 : index
    %6 = vector.load %arg4[%c0_4, %c0_5] : memref<256x512xf32, #tpu.memory_space<vmem>>, vector<256x512xf32>
    %cst_6 = arith.constant dense<0.000000e+00> : vector<24x512xf32>
    %7 = tpu.matmul %3, %6, %cst_6 {dimension_numbers = #tpu.dot_dimension_numbers<[1], [0], [0], [1], [0, 0, 1, 1], [], []>} : vector<24x256xf32>, vector<256x512xf32>, vector<24x512xf32> -> vector<24x512xf32>
    %8 = arith.negf %5 : vector<24x512xf32>
    %9 = math.exp %8 : vector<24x512xf32>
    %cst_7 = arith.constant 1.000000e+00 : f32
    %10 = vector.broadcast %cst_7 : f32 to vector<24x512xf32>
    %11 = arith.addf %10, %9 : vector<24x512xf32>
    %12 = arith.divf %10, %11 : vector<24x512xf32>
    %13 = arith.mulf %5, %12 : vector<24x512xf32>
    %14 = arith.mulf %13, %7 : vector<24x512xf32>
    %c0_8 = arith.constant 0 : index
    %c0_9 = arith.constant 0 : index
    %15 = vector.load %arg7[%c0_8, %c0_9] : memref<24x256xf32, #tpu.memory_space<vmem>>, vector<24x256xf32>
    %c0_10 = arith.constant 0 : index
    %c0_11 = arith.constant 0 : index
    %16 = vector.load %arg5[%c0_10, %c0_11] : memref<512x256xf32, #tpu.memory_space<vmem>>, vector<512x256xf32>
    %cst_12 = arith.constant dense<0.000000e+00> : vector<24x256xf32>
    %17 = tpu.matmul %14, %16, %cst_12 {dimension_numbers = #tpu.dot_dimension_numbers<[1], [0], [0], [1], [0, 0, 1, 1], [], []>} : vector<24x512xf32>, vector<512x256xf32>, vector<24x256xf32> -> vector<24x256xf32>
    %18 = arith.addf %15, %17 : vector<24x256xf32>
    %c0_13 = arith.constant 0 : index
    %c0_14 = arith.constant 0 : index
    %19 = vector.load %arg7[%c0_13, %c0_14] : memref<24x256xf32, #tpu.memory_space<vmem>>, vector<24x256xf32>
    tpu.vector_store %arg7[%c0_13, %c0_14], %18 {strides = array<i32>} : memref<24x256xf32, #tpu.memory_space<vmem>>, vector<24x256xf32>,
    %c1_i32 = arith.constant 1 : i32
    %20 = arith.cmpi eq, %arg1, %c1_i32 : i32
    %21 = arith.extui %20 : i1 to i32
    %c0_i32_15 = arith.constant 0 : i32
    %22 = arith.cmpi ne, %21, %c0_i32_15 : i32
    scf.if %22 {
      %c0_16 = arith.constant 0 : index
      %c0_17 = arith.constant 0 : index
      %23 = vector.load %arg7[%c0_16, %c0_17] : memref<24x256xf32, #tpu.memory_space<vmem>>, vector<24x256xf32>
      %c0_18 = arith.constant 0 : index
      %c0_19 = arith.constant 0 : index
      %24 = vector.load %arg6[%c0_18, %c0_19] : memref<24x256xf32, #tpu.memory_space<vmem>>, vector<24x256xf32>
      tpu.vector_store %arg6[%c0_18, %c0_19], %23 {strides = array<i32>} : memref<24x256xf32, #tpu.memory_space<vmem>>, vector<24x256xf32>,
    } else {
    }
    return
  }
  func.func @transform_0(%arg0: i32, %arg1: i32) -> (i32, i32) {
    %c0_i32 = arith.constant 0 : i32
    %c0_i32_0 = arith.constant 0 : i32
    return %arg0, %c0_i32 : i32, i32
  }
  func.func @transform_1(%arg0: i32, %arg1: i32) -> (i32, i32) {
    %c0_i32 = arith.constant 0 : i32
    %c0_i32_0 = arith.constant 0 : i32
    return %c0_i32, %arg1 : i32, i32
  }
  func.func @transform_2(%arg0: i32, %arg1: i32) -> (i32, i32) {
    %c2_i32 = arith.constant 2 : i32
    %0 = arith.addi %arg1, %c2_i32 : i32
    %c0_i32 = arith.constant 0 : i32
    %c0_i32_0 = arith.constant 0 : i32
    return %c0_i32, %0 : i32, i32
  }
  func.func @transform_3(%arg0: i32, %arg1: i32) -> (i32, i32) {
    %c0_i32 = arith.constant 0 : i32
    %c0_i32_0 = arith.constant 0 : i32
    return %arg1, %c0_i32 : i32, i32
  }
  func.func @transform_4(%arg0: i32, %arg1: i32) -> (i32, i32) {
    %c0_i32 = arith.constant 0 : i32
    %c0_i32_0 = arith.constant 0 : i32
    return %arg0, %c0_i32 : i32, i32
  }
}

</mosaic_0001>

<bundles_post_ra>
// kernel: tpu_custom_call.1
= control target key start
LH: loop header
LB: loop body
LE: loop exit
PB: predicated region body
PF: predicated region fallthrough
CT: control target
= control target key end

     0   :  { %s3362_s0 = inlined_call_operand.hbm [shape: f32[24,256], index: 0, kind: input, shape index: {}]   ;;  %s3363_s1 = inlined_call_operand.hbm [shape: f32[256,2048], index: 1, kind: input, shape index: {}]   ;;  %s3364_s2 = inlined_call_operand.hbm [shape: f32[256,2048], index: 2, kind: input, shape index: {}]   ;;  %s3365_s3 = inlined_call_operand.hbm [shape: f32[1024,256], index: 3, kind: input, shape index: {}]   ;;  %s3366_s4 = inlined_call_operand.hbm [shape: f32[24,256], index: 4, kind: output, shape index: {}]  }
   0x1   :  { %3374 = sst [smem:[#allocation22_spill]] %s3362_s0 }
   0x2   :  { %3375 = sst [smem:[#allocation23_spill]] %s3363_s1 }
   0x3   :  { %3376 = sst [smem:[#allocation24_spill]] %s3364_s2 }
   0x4   :  { %3377 = sst [smem:[#allocation25_spill]] %s3366_s4 }
   0x5   :  { %9 = vsyncpa [#allocation4], 0 }
   0x6   :  { %10 = vsyncpa [#allocation7], 0 }
   0x7   :  { %12 = vsyncpa [#allocation7 + $0x1], 0 }
   0x8   :  { %13 = vsyncpa [#allocation10], 0 }
   0x9   :  { %15 = vsyncpa [#allocation10 + $0x1], 0 }
   0xa   :  { %16 = vsyncpa [#allocation5], 0  ;;  %s2261_s15 = smov 0   ;;  %s2263_s16 = smov 0  }
   0xb   :  { %s2265_s17 = smov 0   ;;  %s2267_s18 = smov 0  }
   0xc   :  { %s2269_s19 = smov 0   ;;  %s2271_s20 = smov 0  }
   0xd   :  { %s2273_s21 = smov 0   ;;  %s2275_s22 = smov 0  }
   0xe   :  { %s2277_s23 = smov 0  }
   0xf LB: > { %3378 = sst [smem:[#allocation17_spill]] %s2200_s17  ;;  %s31_s24 = sadd.s32 1, %s2220_s22  ;;  %s2224_s23 = sphi %s2277_s23, %s22_s23   ;;  %s2220_s22 = sphi %s2275_s22, %s3443_s22   ;;  %s2216_s21 = sphi %s2273_s21, %s3442_s21   ;;  %s2212_s20 = sphi %s2271_s20, %s3441_s20   ;;  %s2208_s19 = sphi %s2269_s19, %s3440_s19   ;;  %s2204_s18 = sphi %s2267_s18, %s3439_s18   ;;  %s2200_s17 = sphi %s2265_s17, %s3434_s17   ;;  %s2196_s16 = sphi %s2263_s16, %s3438_s16   ;;  %s2192_s15 = sphi %s2261_s15, %s3437_s15  }
  0x10   : > { %3379 = sst [smem:[#allocation18_spill]] %s2224_s23  ;;  %s67_s25 = sadd.s32 1, %s2212_s20 }
  0x11   : > { %p32_p0 = scmp.ge.s32.totalorder %s31_s24, 2  ;;  %p74_p1 = scmp.ne.s32.totalorder %s2212_s20, %s2208_s19 }
  0x12   : > { %p75_p2 = scmp.eq.s32.totalorder %s2224_s23, 0  ;;  %s90_s26 = sadd.s32 2, %s2220_s22 }
  0x13   : > { %s3445_s24 = smov (%p32_p0, %s31_s24), 0  ;;  %p1852_p6 = scmp.lt.s32.totalorder %s2224_s23, 2 }
  0x14   : > { %3380 = sst [smem:[#allocation19_spill]] %s3445_s24  ;;  %p2316_p3 = por %p75_p2, %p74_p1 }
  0x15   : > { %s64_s28 = ssub.s32 %s2220_s22, %s3445_s24  ;;  %s91_s29 = sadd.s32 2, %s3445_s24 }
  0x16   : > { %p65_p4 = scmp.eq.s32.totalorder %s64_s28, 0  ;;  %s2323_s30 = ssub.s32 %s90_s26, %s91_s29 }
  0x17   : > { %p93_p5 = scmp.eq.s32.totalorder %s2323_s30, 0  ;;  %s202_s6 = sand.u32 1, %s2224_s23  }
  0x18   : > { %s2328_s5 = scalar_select %p65_p4, %s2212_s20, %s67_s25  }
  0x19   : > { %s3367_s7 = sand.u32 1, %s2212_s20   ;;  %s1820_s9 = sshll.u32 %s2220_s22, 5 }
  0x1a   : > { %3382 = sst [smem:[#allocation20_spill]] %s2328_s5  ;;  %s2334_s8 = sshll.u32 %s3367_s7, 10 }
  0x1b   : > { %s3383_s1 = sld [smem:[#allocation23_spill]]  ;;  %s206_s13 = scalar_lea.vmem [#allocation6], %s2334_s8 }
  0x1c   : > { %s214_s14 = sshll.u32 %s206_s13, 4  ;;  %p2345_p7 = pnand %p1852_p6, %p2316_p3  ;;  %s215_s14 = int_to_ptr.vmem [resolvable:$true] %s214_s14 }
  0x1d   : > { %s2349_s28 = scalar_lea.sflag [#allocation7], %s202_s6  ;;  %s3368_s29 = smov 2048  }
  0x1e   : > { %s3369_s10 = smov 512   ;;  %s3370_s11 = smov 32  }
  0x1f   : > { %s3385_s2 = sld [smem:[#allocation24_spill]]  ;;  %s2364_s6 = sadd.s32 4294967295, %s2224_s23  }
  0x20   : > { %p80_p8 = scmp.ne.s32.totalorder %s2208_s19, %s2204_s18  ;;  %p81_p9 = scmp.eq.s32.totalorder %s2364_s6, 0 }
  0x21   : > { %s211_s12 = scalar_lea.hbm %s3383_s1, %s1820_s9  ;;  %p108_p10 = scmp.ne.s32.totalorder %s2196_s16, %s2192_s15 }
  0x22   : > { %s212_s26 = sshll.u32 %s211_s12, 4  ;;  %p1785_p11 = scmp.ge.s32.totalorder %s2224_s23, 1  ;;  %s213_s26 = int_to_ptr.hbm [resolvable:$true] %s212_s26 }
  0x23   : > { %1844 = dma.hbm_to_vmem [thread:$0]  (!%p2345_p7), %s213_s26, 16384, %s215_s14, %s2349_s28, %s3368_s29, %s3369_s10, %s3370_s11  }
  0x24   : > { %p171_p12 = scmp.lt.s32.totalorder %s2224_s23, 3  ;;  %p2375_p13 = por %p81_p9, %p80_p8 }
  0x25   : > { %s1701_s13 = scalar_lea.hbm %s3385_s2, %s1820_s9  ;;  %p2381_p0 = por %p108_p10, %p81_p9 }
  0x26   : > { %s1702_s7 = scalar_lea.hbm %s1701_s13, 64  ;;  %p2385_p1 = pnand %p1785_p11, %p171_p12 }
  0x27   : > { %s2360_s1 = sshll.u32 %s1702_s7, 4  ;;  %s3389_s0 = sld [smem:[#allocation22_spill]]  ;;  %s236_s1 = int_to_ptr.hbm [resolvable:$true] %s2360_s1 }
  0x28   : > { %p1837_p3 = pneg %p2385_p1  ;;  %s2229_s12 = smov [#allocation3]  }
  0x29   : > { %s188_s27 = sshll.u32 %s2229_s12, 4  ;;  %s2230_s13 = smov 256   ;;  %s189_s27 = int_to_ptr.vmem [resolvable:$true] %s188_s27 }
  0x2a   : > { %p1838_p4 = pnand %p1837_p3, %p81_p9  ;;  %s2231_s29 = smov 16  }
  0x2b   : > { %s95_s10 = sadd.s32 1, %s2200_s17  ;;  %p102_p8 = scmp.ne.s32.totalorder %s2200_s17, %s2196_s16 }
  0x2c   : > { %s2402_s18 = scalar_select %p93_p5, %s2200_s17, %s95_s10  }
  0x2d   : > { %s186_s26 = sshll.u32 %s3389_s0, 4  ;;  %p104_p10 = por %p102_p8, %p75_p2  ;;  %s187_s26 = int_to_ptr.hbm [resolvable:$true] %s186_s26 }
  0x2e   : > { %1840 = dma.hbm_to_vmem [thread:$0]  (!%p1838_p4), %s187_s26, 768, %s189_s27, [#allocation4], %s2230_s13, %s2230_s13, %s2231_s29  }
  0x2f   : > { %3390 = sst [smem:[#allocation21_spill]] %s2402_s18  ;;  %s226_s14 = sand.u32 1, %s2200_s17  }
  0x30   : > { %s1791_s12 = sshll.u32 %s226_s14, 10  ;;  %p1845_p11 = pnand %p1852_p6, %p104_p10 }
  0x31   : > { %s228_s11 = scalar_lea.vmem [#allocation8], %s1791_s12  ;;  %s3391_s2 = smov 32  }
  0x32   : > { %s237_s0 = sshll.u32 %s228_s11, 4  ;;  %s3392_s24 = smov 512   ;;  %s238_s0 = int_to_ptr.vmem [resolvable:$true] %s237_s0 }
  0x33   : > { %s3393_s5 = smov 2048   ;;  %s1822_s26 = sshll.u32 %s2220_s22, 10 }
  0x34   : > { %1847 = dma.hbm_to_vmem [thread:$0]  (!%p1845_p11), %s236_s1, 16384, %s238_s0, %s2349_s28, %s3393_s5, %s3392_s24, %s3391_s2  }
  0x35   : > { %s251_s30 = scalar_lea.vmem [#allocation9], %s2334_s8  ;;  %s257_s4 = scalar_lea.hbm %s3365_s3, %s1822_s26 }
  0x36   : > { %s260_s10 = sshll.u32 %s251_s30, 4  ;;  %s258_s17 = sshll.u32 %s257_s4, 4  ;;  %s261_s10 = int_to_ptr.vmem [resolvable:$true] %s260_s10  ;;  %s259_s17 = int_to_ptr.hbm [resolvable:$true] %s258_s17 }
  0x37   : > { %s3394_s14 = sand.u32 1, %s2212_s20   ;;  %272 = sbr.rel (%p2385_p1) target bundleno = 564 (0x234), region = 36 }
  0x38   : > { %s248_s23 = scalar_lea.sflag [#allocation10], %s3394_s14 }
  0x39   : > { %1850 = dma.hbm_to_vmem [thread:$0]  (!%p2345_p7), %s259_s17, 16384, %s261_s10, %s248_s23, %s2230_s13, %s2230_s13, %s2231_s29  }
  0x3c   : > { %2171 = dma.done.wait (%p81_p9), [#allocation4], 768  }
  0x3d   : > { %2173 = vsyncadd (%p81_p9), [#allocation4], 4294966528  ;;  %s279_s0 = sand.u32 1, %s2364_s6   ;;  %s281_s1 = sand.u32 1, %s2208_s19  }
  0x3e   : > { %s1799_s2 = sshll.u32 %s281_s1, 10  ;;  %s280_s4 = scalar_lea.sflag [#allocation7], %s279_s0 }
  0x3f   : > { %s2432_s24 = scalar_lea.vmem [#allocation6], %s1799_s2 }
  0x40   : > { %2175 = dma.done.wait (%p2375_p13), %s280_s4, 16384  }
  0x41   : > { %2177 = vsyncadd (%p2375_p13), %s280_s4, 4294950912  ;;  %s291_s17 = sand.u32 1, %s2196_s16  }
  0x42   : > { %s1800_s23 = sshll.u32 %s291_s17, 10 }
  0x43   : > { %s2439_s5 = scalar_lea.vmem [#allocation8], %s1800_s23 }
  0x44   : > { %2179 = dma.done.wait (%p2381_p0), %s280_s4, 16384  }
  0x45   : > { %2181 = vsyncadd (%p2381_p0), %s280_s4, 4294950912  ;;  %s300_s8 = scalar_lea.sflag [#allocation10], %s281_s1  ;;  %s2445_s25 = scalar_lea.vmem [#allocation9], %s1799_s2 }
  0x46   : > { %2183 = dma.done.wait (%p2375_p13), %s300_s8, 16384  }
  0x47   : > { %2185 = vsyncadd (%p2375_p13), %s300_s8, 4294950912  ;;  %p1802_p2 = scmp.ne.s32.totalorder %s2216_s21, 0 }
  0x49   : > { %343 = sbr.rel (%p1802_p2) target bundleno = 85 (0x55), region = 56 }
  0x4e   : > { %v2232_v0 = vmov 0.0  }
  0x4f   : > { %344 = vst [vmem:[#allocation2 + $0x28] sm:$0xff] %v2232_v0 }
  0x50   : > { %345 = vst [vmem:[#allocation2 + $0x10] sm:$0xff] %v2232_v0 }
  0x51   : > { %346 = vst [vmem:[#allocation2 + $0x8] sm:$0xff] %v2232_v0 }
  0x52   : > { %347 = vst [vmem:[#allocation2] sm:$0xff] %v2232_v0 }
  0x53   : > { %348 = vst [vmem:[#allocation2 + $0x18] sm:$0xff] %v2232_v0 }
  0x54   : > { %349 = vst [vmem:[#allocation2 + $0x20] sm:$0xff] %v2232_v0 }
  0x55 PF: > { %v416_v1 = vld [vmem:[%s2432_s24 + $0x1e0] sm:$0xff]  ;;  %v417_v3 = vld [vmem:[%s2432_s24 + $0x1e8] sm:$0xff]  ;;  %p1815_p5 = scmp.ne.s32.totalorder %s2216_s21, 1 }
  0x56   : > { %v480_v2 = vld [vmem:[%s2432_s24 + $0x3e0] sm:$0xff]  ;;  %484 = vmatpush.msra.mxu0 %v416_v1  ;;  %v481_v4 = vld [vmem:[%s2432_s24 + $0x3e8] sm:$0xff]  ;;  %536 = vmatpush.msra.mxu2 %v417_v3  ;;  %v2516_v1 = vld [vmem:[#allocation3] sm:$0xff] }
  0x57   : > { %510 = vmatpush.msra.mxu1 %v480_v2  ;;  %v412_v5 = vld [vmem:[%s2432_s24 + $0x1c0] sm:$0xff]  ;;  %562 = vmatpush.msra.mxu3 %v481_v4  ;;  %v413_v7 = vld [vmem:[%s2432_s24 + $0x1c8] sm:$0xff]  ;;  %v2518_v2 = vld [vmem:[#allocation3 + $0x8] sm:$0xff] }
  0x58   : > { %v476_v6 = vld [vmem:[%s2432_s24 + $0x3c0] sm:$0xff]  ;;  %v477_v8 = vld [vmem:[%s2432_s24 + $0x3c8] sm:$0xff]  ;;  %485 = vmatpush.msra.mxu0 %v412_v5  ;;  %537 = vmatpush.msra.mxu2 %v413_v7  ;;  %v418_v3 = vld [vmem:[%s2432_s24 + $0x1f0] sm:$0xff] }
  0x59   : > { %v408_v9 = vld [vmem:[%s2432_s24 + $0x1a0] sm:$0xff]  ;;  %511 = vmatpush.msra.mxu1 %v476_v6  ;;  %v409_v11 = vld [vmem:[%s2432_s24 + $0x1a8] sm:$0xff]  ;;  %563 = vmatpush.msra.mxu3 %v477_v8  ;;  %v482_v4 = vld [vmem:[%s2432_s24 + $0x3f0] sm:$0xff] }
  0x5a   : > { %v472_v10 = vld [vmem:[%s2432_s24 + $0x3a0] sm:$0xff]  ;;  %v473_v12 = vld [vmem:[%s2432_s24 + $0x3a8] sm:$0xff]  ;;  %486 = vmatpush.msra.mxu0 %v408_v9  ;;  %538 = vmatpush.msra.mxu2 %v409_v11  ;;  %v419_v5 = vld [vmem:[%s2432_s24 + $0x1f8] sm:$0xff] }
  0x5b   : > { %v404_v13 = vld [vmem:[%s2432_s24 + $0x180] sm:$0xff]  ;;  %512 = vmatpush.msra.mxu1 %v472_v10  ;;  %v405_v15 = vld [vmem:[%s2432_s24 + $0x188] sm:$0xff]  ;;  %564 = vmatpush.msra.mxu3 %v473_v12  ;;  %v483_v6 = vld [vmem:[%s2432_s24 + $0x3f8] sm:$0xff] }
  0x5c   : > { %v468_v14 = vld [vmem:[%s2432_s24 + $0x380] sm:$0xff]  ;;  %v469_v16 = vld [vmem:[%s2432_s24 + $0x388] sm:$0xff]  ;;  %487 = vmatpush.msra.mxu0 %v404_v13  ;;  %539 = vmatpush.msra.mxu2 %v405_v15  ;;  %v414_v7 = vld [vmem:[%s2432_s24 + $0x1d0] sm:$0xff] }
  0x5d   : > { %v400_v17 = vld [vmem:[%s2432_s24 + $0x160] sm:$0xff]  ;;  %513 = vmatpush.msra.mxu1 %v468_v14  ;;  %v401_v19 = vld [vmem:[%s2432_s24 + $0x168] sm:$0xff]  ;;  %565 = vmatpush.msra.mxu3 %v469_v16  ;;  %v478_v8 = vld [vmem:[%s2432_s24 + $0x3d0] sm:$0xff] }
  0x5e   : > { %v464_v18 = vld [vmem:[%s2432_s24 + $0x360] sm:$0xff]  ;;  %v465_v20 = vld [vmem:[%s2432_s24 + $0x368] sm:$0xff]  ;;  %488 = vmatpush.msra.mxu0 %v400_v17  ;;  %540 = vmatpush.msra.mxu2 %v401_v19  ;;  %v415_v9 = vld [vmem:[%s2432_s24 + $0x1d8] sm:$0xff] }
  0x5f   : > { %v396_v21 = vld [vmem:[%s2432_s24 + $0x140] sm:$0xff]  ;;  %514 = vmatpush.msra.mxu1 %v464_v18  ;;  %v397_v23 = vld [vmem:[%s2432_s24 + $0x148] sm:$0xff]  ;;  %566 = vmatpush.msra.mxu3 %v465_v20  ;;  %v479_v10 = vld [vmem:[%s2432_s24 + $0x3d8] sm:$0xff] }
  0x60   : > { %v460_v22 = vld [vmem:[%s2432_s24 + $0x340] sm:$0xff]  ;;  %v461_v24 = vld [vmem:[%s2432_s24 + $0x348] sm:$0xff]  ;;  %489 = vmatpush.msra.mxu0 %v396_v21  ;;  %541 = vmatpush.msra.mxu2 %v397_v23  ;;  %v410_v11 = vld [vmem:[%s2432_s24 + $0x1b0] sm:$0xff] }
  0x61   : > { %v392_v25 = vld [vmem:[%s2432_s24 + $0x120] sm:$0xff]  ;;  %515 = vmatpush.msra.mxu1 %v460_v22  ;;  %v393_v27 = vld [vmem:[%s2432_s24 + $0x128] sm:$0xff]  ;;  %567 = vmatpush.msra.mxu3 %v461_v24  ;;  %v474_v12 = vld [vmem:[%s2432_s24 + $0x3b0] sm:$0xff] }
  0x62   : > { %v456_v26 = vld [vmem:[%s2432_s24 + $0x320] sm:$0xff]  ;;  %v457_v28 = vld [vmem:[%s2432_s24 + $0x328] sm:$0xff]  ;;  %490 = vmatpush.msra.mxu0 %v392_v25  ;;  %542 = vmatpush.msra.mxu2 %v393_v27  ;;  %v411_v13 = vld [vmem:[%s2432_s24 + $0x1b8] sm:$0xff] }
  0x63   : > { %v388_v29 = vld [vmem:[%s2432_s24 + $0x100] sm:$0xff]  ;;  %516 = vmatpush.msra.mxu1 %v456_v26  ;;  %v389_v31 = vld [vmem:[%s2432_s24 + $0x108] sm:$0xff]  ;;  %568 = vmatpush.msra.mxu3 %v457_v28  ;;  %v475_v14 = vld [vmem:[%s2432_s24 + $0x3b8] sm:$0xff] }
  0x64   : > { %v452_v30 = vld [vmem:[%s2432_s24 + $0x300] sm:$0xff]  ;;  %v453_v32 = vld [vmem:[%s2432_s24 + $0x308] sm:$0xff]  ;;  %491 = vmatpush.msra.mxu0 %v388_v29  ;;  %543 = vmatpush.msra.mxu2 %v389_v31  ;;  %v406_v15 = vld [vmem:[%s2432_s24 + $0x190] sm:$0xff] }
  0x65   : > { %v384_v33 = vld [vmem:[%s2432_s24 + $0xe0] sm:$0xff]  ;;  %517 = vmatpush.msra.mxu1 %v452_v30  ;;  %v385_v35 = vld [vmem:[%s2432_s24 + $0xe8] sm:$0xff]  ;;  %569 = vmatpush.msra.mxu3 %v453_v32  ;;  %v470_v16 = vld [vmem:[%s2432_s24 + $0x390] sm:$0xff] }
  0x66   : > { %v448_v34 = vld [vmem:[%s2432_s24 + $0x2e0] sm:$0xff]  ;;  %v449_v36 = vld [vmem:[%s2432_s24 + $0x2e8] sm:$0xff]  ;;  %492 = vmatpush.msra.mxu0 %v384_v33  ;;  %544 = vmatpush.msra.mxu2 %v385_v35  ;;  %v407_v17 = vld [vmem:[%s2432_s24 + $0x198] sm:$0xff] }
  0x67   : > { %v380_v37 = vld [vmem:[%s2432_s24 + $0xc0] sm:$0xff]  ;;  %518 = vmatpush.msra.mxu1 %v448_v34  ;;  %v381_v39 = vld [vmem:[%s2432_s24 + $0xc8] sm:$0xff]  ;;  %570 = vmatpush.msra.mxu3 %v449_v36  ;;  %v471_v18 = vld [vmem:[%s2432_s24 + $0x398] sm:$0xff] }
  0x68   : > { %v444_v38 = vld [vmem:[%s2432_s24 + $0x2c0] sm:$0xff]  ;;  %v445_v40 = vld [vmem:[%s2432_s24 + $0x2c8] sm:$0xff]  ;;  %493 = vmatpush.msra.mxu0 %v380_v37  ;;  %545 = vmatpush.msra.mxu2 %v381_v39  ;;  %v402_v21 = vld [vmem:[%s2432_s24 + $0x170] sm:$0xff] }
  0x69   : > { %v376_v41 = vld [vmem:[%s2432_s24 + $0xa0] sm:$0xff]  ;;  %519 = vmatpush.msra.mxu1 %v444_v38  ;;  %v377_v43 = vld [vmem:[%s2432_s24 + $0xa8] sm:$0xff]  ;;  %571 = vmatpush.msra.mxu3 %v445_v40  ;;  %v466_v22 = vld [vmem:[%s2432_s24 + $0x370] sm:$0xff] }
  0x6a   : > { %v440_v42 = vld [vmem:[%s2432_s24 + $0x2a0] sm:$0xff]  ;;  %v441_v44 = vld [vmem:[%s2432_s24 + $0x2a8] sm:$0xff]  ;;  %494 = vmatpush.msra.mxu0 %v376_v41  ;;  %546 = vmatpush.msra.mxu2 %v377_v43  ;;  %v403_v23 = vld [vmem:[%s2432_s24 + $0x178] sm:$0xff] }
  0x6b   : > { %v372_v45 = vld [vmem:[%s2432_s24 + $0x80] sm:$0xff]  ;;  %520 = vmatpush.msra.mxu1 %v440_v42  ;;  %v373_v47 = vld [vmem:[%s2432_s24 + $0x88] sm:$0xff]  ;;  %572 = vmatpush.msra.mxu3 %v441_v44  ;;  %v467_v24 = vld [vmem:[%s2432_s24 + $0x378] sm:$0xff] }
  0x6c   : > { %v436_v46 = vld [vmem:[%s2432_s24 + $0x280] sm:$0xff]  ;;  %v437_v48 = vld [vmem:[%s2432_s24 + $0x288] sm:$0xff]  ;;  %495 = vmatpush.msra.mxu0 %v372_v45  ;;  %547 = vmatpush.msra.mxu2 %v373_v47  ;;  %v398_v25 = vld [vmem:[%s2432_s24 + $0x150] sm:$0xff] }
  0x6d   : > { %v368_v49 = vld [vmem:[%s2432_s24 + $0x60] sm:$0xff]  ;;  %521 = vmatpush.msra.mxu1 %v436_v46  ;;  %v369_v51 = vld [vmem:[%s2432_s24 + $0x68] sm:$0xff]  ;;  %573 = vmatpush.msra.mxu3 %v437_v48  ;;  %v462_v26 = vld [vmem:[%s2432_s24 + $0x350] sm:$0xff] }
  0x6e   : > { %v432_v50 = vld [vmem:[%s2432_s24 + $0x260] sm:$0xff]  ;;  %v433_v52 = vld [vmem:[%s2432_s24 + $0x268] sm:$0xff]  ;;  %496 = vmatpush.msra.mxu0 %v368_v49  ;;  %548 = vmatpush.msra.mxu2 %v369_v51  ;;  %v399_v27 = vld [vmem:[%s2432_s24 + $0x158] sm:$0xff] }
  0x6f   : > { %v364_v53 = vld [vmem:[%s2432_s24 + $0x40] sm:$0xff]  ;;  %522 = vmatpush.msra.mxu1 %v432_v50  ;;  %v365_v55 = vld [vmem:[%s2432_s24 + $0x48] sm:$0xff]  ;;  %574 = vmatpush.msra.mxu3 %v433_v52  ;;  %v463_v28 = vld [vmem:[%s2432_s24 + $0x358] sm:$0xff] }
  0x70   : > { %v428_v54 = vld [vmem:[%s2432_s24 + $0x240] sm:$0xff]  ;;  %v429_v56 = vld [vmem:[%s2432_s24 + $0x248] sm:$0xff]  ;;  %497 = vmatpush.msra.mxu0 %v364_v53  ;;  %549 = vmatpush.msra.mxu2 %v365_v55  ;;  %v394_v29 = vld [vmem:[%s2432_s24 + $0x130] sm:$0xff] }
  0x71   : > { %v360_v57 = vld [vmem:[%s2432_s24 + $0x20] sm:$0xff]  ;;  %523 = vmatpush.msra.mxu1 %v428_v54  ;;  %v361_v59 = vld [vmem:[%s2432_s24 + $0x28] sm:$0xff]  ;;  %575 = vmatpush.msra.mxu3 %v429_v56  ;;  %v458_v30 = vld [vmem:[%s2432_s24 + $0x330] sm:$0xff] }
  0x72   : > { %v424_v58 = vld [vmem:[%s2432_s24 + $0x220] sm:$0xff]  ;;  %v425_v60 = vld [vmem:[%s2432_s24 + $0x228] sm:$0xff]  ;;  %498 = vmatpush.msra.mxu0 %v360_v57  ;;  %550 = vmatpush.msra.mxu2 %v361_v59  ;;  %v395_v31 = vld [vmem:[%s2432_s24 + $0x138] sm:$0xff] }
  0x73   : > { %v356_v61 = vld [vmem:[%s2432_s24] sm:$0xff]  ;;  %524 = vmatpush.msra.mxu1 %v424_v58  ;;  %v357_v63 = vld [vmem:[%s2432_s24 + $0x8] sm:$0xff]  ;;  %576 = vmatpush.msra.mxu3 %v425_v60  ;;  %v459_v32 = vld [vmem:[%s2432_s24 + $0x338] sm:$0xff] }
  0x74   : > { %v420_v62 = vld [vmem:[%s2432_s24 + $0x200] sm:$0xff]  ;;  %v421_v0 = vld [vmem:[%s2432_s24 + $0x208] sm:$0xff]  ;;  %499 = vmatpush.msra.mxu0 %v356_v61  ;;  %551 = vmatpush.msra.mxu2 %v357_v63  ;;  %v390_v33 = vld [vmem:[%s2432_s24 + $0x110] sm:$0xff] }
  0x75   : > { %525 = vmatpush.msra.mxu1 %v420_v62  ;;  %577 = vmatpush.msra.mxu3 %v421_v0  ;;  %v2540_v19 = vld [vmem:[#allocation3 + $0x10] sm:$0xff]  ;;  %v2542_v20 = vld [vmem:[#allocation3 + $0x18] sm:$0xff]  ;;  %v454_v34 = vld [vmem:[%s2432_s24 + $0x310] sm:$0xff] }
  0x76   : > { %500 = vmatmul.f32.vlgmr.msra.gmra.mxu0 %v2516_v1  ;;  %526 = vmatmul.f32.vlgmr.msra.gmra.mxu1 %v2518_v2  ;;  %v391_v35 = vld [vmem:[%s2432_s24 + $0x118] sm:$0xff]  ;;  %v2564_v37 = vld [vmem:[#allocation3 + $0x20] sm:$0xff] }
  0x77   : > { %552 = vmatmul.f32.vlgmr.msra.gmra.mxu2 %v2516_v1  ;;  %578 = vmatmul.f32.vlgmr.msra.gmra.mxu3 %v2518_v2  ;;  %v455_v36 = vld [vmem:[%s2432_s24 + $0x318] sm:$0xff]  ;;  %v386_v39 = vld [vmem:[%s2432_s24 + $0xf0] sm:$0xff] }
  0x78   : > { %588 = vmatpush.msrb.mxu0 %v418_v3  ;;  %614 = vmatpush.msrb.mxu1 %v482_v4  ;;  %v2566_v38 = vld [vmem:[#allocation3 + $0x28] sm:$0xff]  ;;  %v450_v40 = vld [vmem:[%s2432_s24 + $0x2f0] sm:$0xff] }
  0x79   : > { %640 = vmatpush.msrb.mxu2 %v419_v5  ;;  %666 = vmatpush.msrb.mxu3 %v483_v6  ;;  %v387_v41 = vld [vmem:[%s2432_s24 + $0xf8] sm:$0xff]  ;;  %v382_v43 = vld [vmem:[%s2432_s24 + $0xd0] sm:$0xff] }
  0x7a   : > { %589 = vmatpush.msrb.mxu0 %v414_v7  ;;  %615 = vmatpush.msrb.mxu1 %v478_v8  ;;  %v451_v42 = vld [vmem:[%s2432_s24 + $0x2f8] sm:$0xff]  ;;  %v446_v44 = vld [vmem:[%s2432_s24 + $0x2d0] sm:$0xff] }
  0x7b   : > { %641 = vmatpush.msrb.mxu2 %v415_v9  ;;  %667 = vmatpush.msrb.mxu3 %v479_v10  ;;  %v383_v45 = vld [vmem:[%s2432_s24 + $0xd8] sm:$0xff]  ;;  %v378_v47 = vld [vmem:[%s2432_s24 + $0xb0] sm:$0xff]  ;;  %v752_v9 = vld [vmem:[%s2439_s5 + $0x1e0] sm:$0xff] }
  0x7c   : > { %590 = vmatpush.msrb.mxu0 %v410_v11  ;;  %616 = vmatpush.msrb.mxu1 %v474_v12  ;;  %v447_v46 = vld [vmem:[%s2432_s24 + $0x2d8] sm:$0xff]  ;;  %v442_v48 = vld [vmem:[%s2432_s24 + $0x2b0] sm:$0xff]  ;;  %v816_v10 = vld [vmem:[%s2439_s5 + $0x3e0] sm:$0xff] }
  0x7d   : > { %642 = vmatpush.msrb.mxu2 %v411_v13  ;;  %668 = vmatpush.msrb.mxu3 %v475_v14  ;;  %v379_v49 = vld [vmem:[%s2432_s24 + $0xb8] sm:$0xff]  ;;  %v374_v51 = vld [vmem:[%s2432_s24 + $0x90] sm:$0xff]  ;;  %v753_v11 = vld [vmem:[%s2439_s5 + $0x1e8] sm:$0xff] }
  0x7e   : > { %591 = vmatpush.msrb.mxu0 %v406_v15  ;;  %617 = vmatpush.msrb.mxu1 %v470_v16  ;;  %v443_v50 = vld [vmem:[%s2432_s24 + $0x2b8] sm:$0xff]  ;;  %v438_v52 = vld [vmem:[%s2432_s24 + $0x290] sm:$0xff]  ;;  %v817_v12 = vld [vmem:[%s2439_s5 + $0x3e8] sm:$0xff] }
  0x7f   : > { %643 = vmatpush.msrb.mxu2 %v407_v17  ;;  %669 = vmatpush.msrb.mxu3 %v471_v18  ;;  %v375_v53 = vld [vmem:[%s2432_s24 + $0x98] sm:$0xff]  ;;  %v370_v55 = vld [vmem:[%s2432_s24 + $0x70] sm:$0xff]  ;;  %v748_v13 = vld [vmem:[%s2439_s5 + $0x1c0] sm:$0xff] }
  0x80   : > { %503 = vmatmul.f32.gmra.mxu0 %v2540_v19  ;;  %529 = vmatmul.f32.gmra.mxu1 %v2542_v20  ;;  %v439_v54 = vld [vmem:[%s2432_s24 + $0x298] sm:$0xff]  ;;  %v434_v56 = vld [vmem:[%s2432_s24 + $0x270] sm:$0xff]  ;;  %v812_v14 = vld [vmem:[%s2439_s5 + $0x3c0] sm:$0xff] }
  0x81   : > { %555 = vmatmul.f32.gmra.mxu2 %v2540_v19  ;;  %581 = vmatmul.f32.gmra.mxu3 %v2542_v20  ;;  %v371_v57 = vld [vmem:[%s2432_s24 + $0x78] sm:$0xff]  ;;  %v366_v59 = vld [vmem:[%s2432_s24 + $0x50] sm:$0xff]  ;;  %v749_v15 = vld [vmem:[%s2439_s5 + $0x1c8] sm:$0xff] }
  0x82   : > { %592 = vmatpush.msrb.mxu0 %v402_v21  ;;  %618 = vmatpush.msrb.mxu1 %v466_v22  ;;  %v435_v58 = vld [vmem:[%s2432_s24 + $0x278] sm:$0xff]  ;;  %v430_v60 = vld [vmem:[%s2432_s24 + $0x250] sm:$0xff]  ;;  %v813_v16 = vld [vmem:[%s2439_s5 + $0x3c8] sm:$0xff] }
  0x83   : > { %644 = vmatpush.msrb.mxu2 %v403_v23  ;;  %670 = vmatpush.msrb.mxu3 %v467_v24  ;;  %v367_v61 = vld [vmem:[%s2432_s24 + $0x58] sm:$0xff]  ;;  %v362_v63 = vld [vmem:[%s2432_s24 + $0x30] sm:$0xff]  ;;  %v744_v17 = vld [vmem:[%s2439_s5 + $0x1a0] sm:$0xff] }
  0x84   : > { %593 = vmatpush.msrb.mxu0 %v398_v25  ;;  %619 = vmatpush.msrb.mxu1 %v462_v26  ;;  %v431_v62 = vld [vmem:[%s2432_s24 + $0x258] sm:$0xff]  ;;  %v426_v0 = vld [vmem:[%s2432_s24 + $0x230] sm:$0xff]  ;;  %v808_v18 = vld [vmem:[%s2439_s5 + $0x3a0] sm:$0xff] }
  0x85   : > { %645 = vmatpush.msrb.mxu2 %v399_v27  ;;  %671 = vmatpush.msrb.mxu3 %v463_v28  ;;  %v363_v3 = vld [vmem:[%s2432_s24 + $0x38] sm:$0xff]  ;;  %v358_v5 = vld [vmem:[%s2432_s24 + $0x10] sm:$0xff]  ;;  %v745_v21 = vld [vmem:[%s2439_s5 + $0x1a8] sm:$0xff] }
  0x86   : > { %594 = vmatpush.msrb.mxu0 %v394_v29  ;;  %620 = vmatpush.msrb.mxu1 %v458_v30  ;;  %v427_v4 = vld [vmem:[%s2432_s24 + $0x238] sm:$0xff]  ;;  %v422_v6 = vld [vmem:[%s2432_s24 + $0x210] sm:$0xff]  ;;  %v809_v22 = vld [vmem:[%s2439_s5 + $0x3a8] sm:$0xff] }
  0x87   : > { %646 = vmatpush.msrb.mxu2 %v395_v31  ;;  %672 = vmatpush.msrb.mxu3 %v459_v32  ;;  %v359_v7 = vld [vmem:[%s2432_s24 + $0x18] sm:$0xff]  ;;  %v740_v23 = vld [vmem:[%s2439_s5 + $0x180] sm:$0xff]  ;;  %v741_v25 = vld [vmem:[%s2439_s5 + $0x188] sm:$0xff] }
  0x88   : > { %595 = vmatpush.msrb.mxu0 %v390_v33  ;;  %621 = vmatpush.msrb.mxu1 %v454_v34  ;;  %v423_v8 = vld [vmem:[%s2432_s24 + $0x218] sm:$0xff]  ;;  %v804_v24 = vld [vmem:[%s2439_s5 + $0x380] sm:$0xff]  ;;  %v805_v26 = vld [vmem:[%s2439_s5 + $0x388] sm:$0xff] }
  0x89   : > { %647 = vmatpush.msrb.mxu2 %v391_v35  ;;  %673 = vmatpush.msrb.mxu3 %v455_v36  ;;  %v736_v27 = vld [vmem:[%s2439_s5 + $0x160] sm:$0xff]  ;;  %v737_v29 = vld [vmem:[%s2439_s5 + $0x168] sm:$0xff] }
  0x8a   : > { %506 = vmatmul.f32.gmra.mxu0 %v2564_v37  ;;  %532 = vmatmul.f32.gmra.mxu1 %v2566_v38  ;;  %v800_v28 = vld [vmem:[%s2439_s5 + $0x360] sm:$0xff]  ;;  %v801_v30 = vld [vmem:[%s2439_s5 + $0x368] sm:$0xff] }
  0x8b   : > { %558 = vmatmul.f32.gmra.mxu2 %v2564_v37  ;;  %584 = vmatmul.f32.gmra.mxu3 %v2566_v38  ;;  %v732_v31 = vld [vmem:[%s2439_s5 + $0x140] sm:$0xff]  ;;  %v733_v33 = vld [vmem:[%s2439_s5 + $0x148] sm:$0xff] }
  0x8c   : > { %596 = vmatpush.msrb.mxu0 %v386_v39  ;;  %622 = vmatpush.msrb.mxu1 %v450_v40  ;;  %v796_v32 = vld [vmem:[%s2439_s5 + $0x340] sm:$0xff]  ;;  %v797_v34 = vld [vmem:[%s2439_s5 + $0x348] sm:$0xff] }
  0x8d   : > { %648 = vmatpush.msrb.mxu2 %v387_v41  ;;  %674 = vmatpush.msrb.mxu3 %v451_v42  ;;  %v728_v35 = vld [vmem:[%s2439_s5 + $0x120] sm:$0xff]  ;;  %v729_v39 = vld [vmem:[%s2439_s5 + $0x128] sm:$0xff] }
  0x8e   : > { %597 = vmatpush.msrb.mxu0 %v382_v43  ;;  %623 = vmatpush.msrb.mxu1 %v446_v44  ;;  %v792_v36 = vld [vmem:[%s2439_s5 + $0x320] sm:$0xff]  ;;  %v793_v40 = vld [vmem:[%s2439_s5 + $0x328] sm:$0xff] }
  0x8f   : > { %649 = vmatpush.msrb.mxu2 %v383_v45  ;;  %675 = vmatpush.msrb.mxu3 %v447_v46  ;;  %v724_v41 = vld [vmem:[%s2439_s5 + $0x100] sm:$0xff]  ;;  %v725_v43 = vld [vmem:[%s2439_s5 + $0x108] sm:$0xff] }
  0x90   : > { %598 = vmatpush.msrb.mxu0 %v378_v47  ;;  %624 = vmatpush.msrb.mxu1 %v442_v48  ;;  %v788_v42 = vld [vmem:[%s2439_s5 + $0x300] sm:$0xff]  ;;  %v789_v44 = vld [vmem:[%s2439_s5 + $0x308] sm:$0xff] }
  0x91   : > { %650 = vmatpush.msrb.mxu2 %v379_v49  ;;  %676 = vmatpush.msrb.mxu3 %v443_v50  ;;  %v720_v45 = vld [vmem:[%s2439_s5 + $0xe0] sm:$0xff]  ;;  %v721_v47 = vld [vmem:[%s2439_s5 + $0xe8] sm:$0xff] }
  0x92   : > { %599 = vmatpush.msrb.mxu0 %v374_v51  ;;  %625 = vmatpush.msrb.mxu1 %v438_v52  ;;  %v784_v46 = vld [vmem:[%s2439_s5 + $0x2e0] sm:$0xff]  ;;  %v785_v48 = vld [vmem:[%s2439_s5 + $0x2e8] sm:$0xff] }
  0x93   : > { %651 = vmatpush.msrb.mxu2 %v375_v53  ;;  %677 = vmatpush.msrb.mxu3 %v439_v54  ;;  %v716_v49 = vld [vmem:[%s2439_s5 + $0xc0] sm:$0xff]  ;;  %v717_v51 = vld [vmem:[%s2439_s5 + $0xc8] sm:$0xff] }
  0x94   : > { %600 = vmatpush.msrb.mxu0 %v370_v55  ;;  %626 = vmatpush.msrb.mxu1 %v434_v56  ;;  %v780_v50 = vld [vmem:[%s2439_s5 + $0x2c0] sm:$0xff]  ;;  %v781_v52 = vld [vmem:[%s2439_s5 + $0x2c8] sm:$0xff] }
  0x95   : > { %652 = vmatpush.msrb.mxu2 %v371_v57  ;;  %678 = vmatpush.msrb.mxu3 %v435_v58  ;;  %v712_v53 = vld [vmem:[%s2439_s5 + $0xa0] sm:$0xff]  ;;  %v713_v55 = vld [vmem:[%s2439_s5 + $0xa8] sm:$0xff] }
  0x96   : > { %601 = vmatpush.msrb.mxu0 %v366_v59  ;;  %627 = vmatpush.msrb.mxu1 %v430_v60  ;;  %v776_v54 = vld [vmem:[%s2439_s5 + $0x2a0] sm:$0xff]  ;;  %v777_v56 = vld [vmem:[%s2439_s5 + $0x2a8] sm:$0xff] }
  0x97   : > { %653 = vmatpush.msrb.mxu2 %v367_v61  ;;  %679 = vmatpush.msrb.mxu3 %v431_v62  ;;  %v708_v57 = vld [vmem:[%s2439_s5 + $0x80] sm:$0xff]  ;;  %v709_v59 = vld [vmem:[%s2439_s5 + $0x88] sm:$0xff] }
  0x98   : > { %602 = vmatpush.msrb.mxu0 %v362_v63  ;;  %628 = vmatpush.msrb.mxu1 %v426_v0  ;;  %v772_v58 = vld [vmem:[%s2439_s5 + $0x280] sm:$0xff]  ;;  %v773_v60 = vld [vmem:[%s2439_s5 + $0x288] sm:$0xff] }
  0x99   : > { %654 = vmatpush.msrb.mxu2 %v363_v3  ;;  %680 = vmatpush.msrb.mxu3 %v427_v4  ;;  %v704_v61 = vld [vmem:[%s2439_s5 + $0x60] sm:$0xff]  ;;  %v705_v63 = vld [vmem:[%s2439_s5 + $0x68] sm:$0xff] }
  0x9a   : > { %603 = vmatpush.msrb.mxu0 %v358_v5  ;;  %629 = vmatpush.msrb.mxu1 %v422_v6  ;;  %v768_v62 = vld [vmem:[%s2439_s5 + $0x260] sm:$0xff]  ;;  %v769_v0 = vld [vmem:[%s2439_s5 + $0x268] sm:$0xff] }
  0x9b   : > { %655 = vmatpush.msrb.mxu2 %v359_v7  ;;  %681 = vmatpush.msrb.mxu3 %v423_v8  ;;  %v700_v3 = vld [vmem:[%s2439_s5 + $0x40] sm:$0xff]  ;;  %v701_v5 = vld [vmem:[%s2439_s5 + $0x48] sm:$0xff] }
  0x9c   : > { %604 = vmatmul.f32.vlgmr.msrb.gmra.mxu0 %v2516_v1  ;;  %630 = vmatmul.f32.vlgmr.msrb.gmra.mxu1 %v2518_v2  ;;  %v764_v4 = vld [vmem:[%s2439_s5 + $0x240] sm:$0xff]  ;;  %v765_v6 = vld [vmem:[%s2439_s5 + $0x248] sm:$0xff] }
  0x9d   : > { %656 = vmatmul.f32.vlgmr.msrb.gmra.mxu2 %v2516_v1  ;;  %682 = vmatmul.f32.vlgmr.msrb.gmra.mxu3 %v2518_v2  ;;  %v696_v7 = vld [vmem:[%s2439_s5 + $0x20] sm:$0xff] }
  0x9e   : > { %820 = vmatpush.msra.mxu0 %v752_v9  ;;  %846 = vmatpush.msra.mxu1 %v816_v10  ;;  %v760_v8 = vld [vmem:[%s2439_s5 + $0x220] sm:$0xff]  ;;  %v697_v9 = vld [vmem:[%s2439_s5 + $0x28] sm:$0xff] }
  0x9f   : > { %872 = vmatpush.msra.mxu2 %v753_v11  ;;  %898 = vmatpush.msra.mxu3 %v817_v12  ;;  %v761_v10 = vld [vmem:[%s2439_s5 + $0x228] sm:$0xff]  ;;  %v692_v11 = vld [vmem:[%s2439_s5] sm:$0xff] }
  0xa0   : > { %821 = vmatpush.msra.mxu0 %v748_v13  ;;  %847 = vmatpush.msra.mxu1 %v812_v14  ;;  %v756_v12 = vld [vmem:[%s2439_s5 + $0x200] sm:$0xff]  ;;  %v693_v13 = vld [vmem:[%s2439_s5 + $0x8] sm:$0xff] }
  0xa1   : > { %873 = vmatpush.msra.mxu2 %v749_v15  ;;  %899 = vmatpush.msra.mxu3 %v813_v16  ;;  %v757_v14 = vld [vmem:[%s2439_s5 + $0x208] sm:$0xff]  ;;  %v754_v15 = vld [vmem:[%s2439_s5 + $0x1f0] sm:$0xff] }
  0xa2   : > { %822 = vmatpush.msra.mxu0 %v744_v17  ;;  %848 = vmatpush.msra.mxu1 %v808_v18  ;;  %v818_v16 = vld [vmem:[%s2439_s5 + $0x3f0] sm:$0xff]  ;;  %v755_v17 = vld [vmem:[%s2439_s5 + $0x1f8] sm:$0xff] }
  0xa3   : > { %874 = vmatpush.msra.mxu2 %v745_v21  ;;  %900 = vmatpush.msra.mxu3 %v809_v22  ;;  %v819_v18 = vld [vmem:[%s2439_s5 + $0x3f8] sm:$0xff]  ;;  %v750_v21 = vld [vmem:[%s2439_s5 + $0x1d0] sm:$0xff] }
  0xa4   : > { %823 = vmatpush.msra.mxu0 %v740_v23  ;;  %849 = vmatpush.msra.mxu1 %v804_v24  ;;  %v814_v22 = vld [vmem:[%s2439_s5 + $0x3d0] sm:$0xff]  ;;  %v751_v23 = vld [vmem:[%s2439_s5 + $0x1d8] sm:$0xff] }
  0xa5   : > { %875 = vmatpush.msra.mxu2 %v741_v25  ;;  %901 = vmatpush.msra.mxu3 %v805_v26  ;;  %v815_v24 = vld [vmem:[%s2439_s5 + $0x3d8] sm:$0xff]  ;;  %v746_v25 = vld [vmem:[%s2439_s5 + $0x1b0] sm:$0xff] }
  0xa6   : > { %607 = vmatmul.f32.gmra.mxu0 %v2540_v19  ;;  %633 = vmatmul.f32.gmra.mxu1 %v2542_v20  ;;  %v810_v26 = vld [vmem:[%s2439_s5 + $0x3b0] sm:$0xff] }
  0xa7   : > { %659 = vmatmul.f32.gmra.mxu2 %v2540_v19  ;;  %685 = vmatmul.f32.gmra.mxu3 %v2542_v20 }
  0xa8   : > { %824 = vmatpush.msra.mxu0 %v736_v27  ;;  %850 = vmatpush.msra.mxu1 %v800_v28  ;;  %v747_v27 = vld [vmem:[%s2439_s5 + $0x1b8] sm:$0xff] }
  0xa9   : > { %876 = vmatpush.msra.mxu2 %v737_v29  ;;  %902 = vmatpush.msra.mxu3 %v801_v30  ;;  %v811_v28 = vld [vmem:[%s2439_s5 + $0x3b8] sm:$0xff]  ;;  %v742_v29 = vld [vmem:[%s2439_s5 + $0x190] sm:$0xff] }
  0xaa   : > { %825 = vmatpush.msra.mxu0 %v732_v31  ;;  %851 = vmatpush.msra.mxu1 %v796_v32  ;;  %v806_v30 = vld [vmem:[%s2439_s5 + $0x390] sm:$0xff]  ;;  %v743_v31 = vld [vmem:[%s2439_s5 + $0x198] sm:$0xff] }
  0xab   : > { %877 = vmatpush.msra.mxu2 %v733_v33  ;;  %903 = vmatpush.msra.mxu3 %v797_v34  ;;  %v807_v32 = vld [vmem:[%s2439_s5 + $0x398] sm:$0xff]  ;;  %v738_v33 = vld [vmem:[%s2439_s5 + $0x170] sm:$0xff] }
  0xac   : > { %826 = vmatpush.msra.mxu0 %v728_v35  ;;  %852 = vmatpush.msra.mxu1 %v792_v36  ;;  %v802_v34 = vld [vmem:[%s2439_s5 + $0x370] sm:$0xff]  ;;  %v739_v35 = vld [vmem:[%s2439_s5 + $0x178] sm:$0xff] }
  0xad   : > { %878 = vmatpush.msra.mxu2 %v729_v39  ;;  %904 = vmatpush.msra.mxu3 %v793_v40  ;;  %v803_v36 = vld [vmem:[%s2439_s5 + $0x378] sm:$0xff]  ;;  %v734_v39 = vld [vmem:[%s2439_s5 + $0x150] sm:$0xff] }
  0xae   : > { %827 = vmatpush.msra.mxu0 %v724_v41  ;;  %853 = vmatpush.msra.mxu1 %v788_v42  ;;  %v798_v40 = vld [vmem:[%s2439_s5 + $0x350] sm:$0xff]  ;;  %v735_v41 = vld [vmem:[%s2439_s5 + $0x158] sm:$0xff] }
  0xaf   : > { %879 = vmatpush.msra.mxu2 %v725_v43  ;;  %905 = vmatpush.msra.mxu3 %v789_v44  ;;  %v799_v42 = vld [vmem:[%s2439_s5 + $0x358] sm:$0xff]  ;;  %v730_v43 = vld [vmem:[%s2439_s5 + $0x130] sm:$0xff] }
  0xb0   : > { %610 = vmatmul.f32.gmra.mxu0 %v2564_v37  ;;  %636 = vmatmul.f32.gmra.mxu1 %v2566_v38  ;;  %v794_v44 = vld [vmem:[%s2439_s5 + $0x330] sm:$0xff] }
  0xb1   : > { %662 = vmatmul.f32.gmra.mxu2 %v2564_v37  ;;  %688 = vmatmul.f32.gmra.mxu3 %v2566_v38 }
  0xb2   : > { %828 = vmatpush.msra.mxu0 %v720_v45  ;;  %854 = vmatpush.msra.mxu1 %v784_v46  ;;  %v731_v45 = vld [vmem:[%s2439_s5 + $0x138] sm:$0xff] }
  0xb3   : > { %880 = vmatpush.msra.mxu2 %v721_v47  ;;  %906 = vmatpush.msra.mxu3 %v785_v48  ;;  %v795_v46 = vld [vmem:[%s2439_s5 + $0x338] sm:$0xff]  ;;  %v726_v47 = vld [vmem:[%s2439_s5 + $0x110] sm:$0xff] }
  0xb4   : > { %829 = vmatpush.msra.mxu0 %v716_v49  ;;  %855 = vmatpush.msra.mxu1 %v780_v50  ;;  %v790_v48 = vld [vmem:[%s2439_s5 + $0x310] sm:$0xff]  ;;  %v727_v49 = vld [vmem:[%s2439_s5 + $0x118] sm:$0xff] }
  0xb5   : > { %881 = vmatpush.msra.mxu2 %v717_v51  ;;  %907 = vmatpush.msra.mxu3 %v781_v52  ;;  %v791_v50 = vld [vmem:[%s2439_s5 + $0x318] sm:$0xff]  ;;  %v722_v51 = vld [vmem:[%s2439_s5 + $0xf0] sm:$0xff] }
  0xb6   : > { %830 = vmatpush.msra.mxu0 %v712_v53  ;;  %856 = vmatpush.msra.mxu1 %v776_v54  ;;  %v786_v52 = vld [vmem:[%s2439_s5 + $0x2f0] sm:$0xff]  ;;  %v723_v53 = vld [vmem:[%s2439_s5 + $0xf8] sm:$0xff] }
  0xb7   : > { %882 = vmatpush.msra.mxu2 %v713_v55  ;;  %908 = vmatpush.msra.mxu3 %v777_v56  ;;  %v787_v54 = vld [vmem:[%s2439_s5 + $0x2f8] sm:$0xff]  ;;  %v718_v55 = vld [vmem:[%s2439_s5 + $0xd0] sm:$0xff] }
  0xb8   : > { %831 = vmatpush.msra.mxu0 %v708_v57  ;;  %857 = vmatpush.msra.mxu1 %v772_v58  ;;  %v782_v56 = vld [vmem:[%s2439_s5 + $0x2d0] sm:$0xff]  ;;  %v719_v57 = vld [vmem:[%s2439_s5 + $0xd8] sm:$0xff] }
  0xb9   : > { %883 = vmatpush.msra.mxu2 %v709_v59  ;;  %909 = vmatpush.msra.mxu3 %v773_v60  ;;  %v783_v58 = vld [vmem:[%s2439_s5 + $0x2d8] sm:$0xff]  ;;  %v714_v59 = vld [vmem:[%s2439_s5 + $0xb0] sm:$0xff] }
  0xba   : > { %832 = vmatpush.msra.mxu0 %v704_v61  ;;  %858 = vmatpush.msra.mxu1 %v768_v62  ;;  %v778_v60 = vld [vmem:[%s2439_s5 + $0x2b0] sm:$0xff]  ;;  %v715_v61 = vld [vmem:[%s2439_s5 + $0xb8] sm:$0xff] }
  0xbb   : > { %884 = vmatpush.msra.mxu2 %v705_v63  ;;  %910 = vmatpush.msra.mxu3 %v769_v0  ;;  %v779_v62 = vld [vmem:[%s2439_s5 + $0x2b8] sm:$0xff]  ;;  %v710_v63 = vld [vmem:[%s2439_s5 + $0x90] sm:$0xff] }
  0xbc   : > { %833 = vmatpush.msra.mxu0 %v700_v3  ;;  %859 = vmatpush.msra.mxu1 %v764_v4  ;;  %v774_v0 = vld [vmem:[%s2439_s5 + $0x290] sm:$0xff]  ;;  %v711_v3 = vld [vmem:[%s2439_s5 + $0x98] sm:$0xff] }
  0xbd   : > { %885 = vmatpush.msra.mxu2 %v701_v5  ;;  %911 = vmatpush.msra.mxu3 %v765_v6  ;;  %v775_v4 = vld [vmem:[%s2439_s5 + $0x298] sm:$0xff]  ;;  %v706_v5 = vld [vmem:[%s2439_s5 + $0x70] sm:$0xff] }
  0xbe   : > { %834 = vmatpush.msra.mxu0 %v696_v7  ;;  %860 = vmatpush.msra.mxu1 %v760_v8  ;;  %v770_v6 = vld [vmem:[%s2439_s5 + $0x270] sm:$0xff]  ;;  %v707_v7 = vld [vmem:[%s2439_s5 + $0x78] sm:$0xff] }
  0xbf   : > { %886 = vmatpush.msra.mxu2 %v697_v9  ;;  %912 = vmatpush.msra.mxu3 %v761_v10  ;;  %v771_v8 = vld [vmem:[%s2439_s5 + $0x278] sm:$0xff]  ;;  %v702_v9 = vld [vmem:[%s2439_s5 + $0x50] sm:$0xff] }
  0xc0   : > { %835 = vmatpush.msra.mxu0 %v692_v11  ;;  %861 = vmatpush.msra.mxu1 %v756_v12  ;;  %v766_v10 = vld [vmem:[%s2439_s5 + $0x250] sm:$0xff]  ;;  %v703_v11 = vld [vmem:[%s2439_s5 + $0x58] sm:$0xff] }
  0xc1   : > { %887 = vmatpush.msra.mxu2 %v693_v13  ;;  %913 = vmatpush.msra.mxu3 %v757_v14  ;;  %v767_v12 = vld [vmem:[%s2439_s5 + $0x258] sm:$0xff]  ;;  %v698_v13 = vld [vmem:[%s2439_s5 + $0x30] sm:$0xff] }
  0xc2   : > { %836 = vmatmul.f32.vlgmr.msra.gmra.mxu0 %v2516_v1  ;;  %862 = vmatmul.f32.vlgmr.msra.gmra.mxu1 %v2518_v2  ;;  %v762_v14 = vld [vmem:[%s2439_s5 + $0x230] sm:$0xff] }
  0xc3   : > { %888 = vmatmul.f32.vlgmr.msra.gmra.mxu2 %v2516_v1  ;;  %914 = vmatmul.f32.vlgmr.msra.gmra.mxu3 %v2518_v2 }
  0xc4   : > { %924 = vmatpush.msrb.mxu0 %v754_v15  ;;  %950 = vmatpush.msrb.mxu1 %v818_v16  ;;  %v699_v15 = vld [vmem:[%s2439_s5 + $0x38] sm:$0xff] }
  0xc5   : > { %976 = vmatpush.msrb.mxu2 %v755_v17  ;;  %1002 = vmatpush.msrb.mxu3 %v819_v18  ;;  %v763_v16 = vld [vmem:[%s2439_s5 + $0x238] sm:$0xff]  ;;  %v694_v17 = vld [vmem:[%s2439_s5 + $0x10] sm:$0xff] }
  0xc6   : > { %925 = vmatpush.msrb.mxu0 %v750_v21  ;;  %951 = vmatpush.msrb.mxu1 %v814_v22  ;;  %v758_v18 = vld [vmem:[%s2439_s5 + $0x210] sm:$0xff]  ;;  %v695_v21 = vld [vmem:[%s2439_s5 + $0x18] sm:$0xff] }
  0xc7   : > { %977 = vmatpush.msrb.mxu2 %v751_v23  ;;  %1003 = vmatpush.msrb.mxu3 %v815_v24  ;;  %v759_v22 = vld [vmem:[%s2439_s5 + $0x218] sm:$0xff]  ;;  %v1314_v24 = vld [vmem:[%s2445_s25 + $0xe0] sm:$0xff] }
  0xc8   : > { %926 = vmatpush.msrb.mxu0 %v746_v25  ;;  %952 = vmatpush.msrb.mxu1 %v810_v26  ;;  %v1348_v25 = vld [vmem:[%s2445_s25 + $0x1f0] sm:$0xff] }
  0xc9   : > { %978 = vmatpush.msrb.mxu2 %v747_v27  ;;  %1004 = vmatpush.msrb.mxu3 %v811_v28 }
  0xca   : > { %927 = vmatpush.msrb.mxu0 %v742_v29  ;;  %953 = vmatpush.msrb.mxu1 %v806_v30  ;;  %v1306_v29 = vld [vmem:[%s2445_s25 + $0xa0] sm:$0xff]  ;;  %v1344_v30 = vld [vmem:[%s2445_s25 + $0x1d0] sm:$0xff] }
  0xcb   : > { %979 = vmatpush.msrb.mxu2 %v743_v31  ;;  %1005 = vmatpush.msrb.mxu3 %v807_v32 }
  0xcc   : > { %839 = vmatmul.f32.gmra.mxu0 %v2540_v19  ;;  %865 = vmatmul.f32.gmra.mxu1 %v2542_v20 }
  0xcd   : > { %891 = vmatmul.f32.gmra.mxu2 %v2540_v19  ;;  %917 = vmatmul.f32.gmra.mxu3 %v2542_v20 }
  0xce   : > { %928 = vmatpush.msrb.mxu0 %v738_v33  ;;  %954 = vmatpush.msrb.mxu1 %v802_v34  ;;  %v1304_v34 = vld [vmem:[%s2445_s25 + $0x90] sm:$0xff] }
  0xcf   : > { %980 = vmatpush.msrb.mxu2 %v739_v35  ;;  %1006 = vmatpush.msrb.mxu3 %v803_v36  ;;  %v1342_v35 = vld [vmem:[%s2445_s25 + $0x1c0] sm:$0xff] }
  0xd0   : > { %929 = vmatpush.msrb.mxu0 %v734_v39  ;;  %955 = vmatpush.msrb.mxu1 %v798_v40  ;;  %v1302_v39 = vld [vmem:[%s2445_s25 + $0x80] sm:$0xff]  ;;  %v1340_v40 = vld [vmem:[%s2445_s25 + $0x1b0] sm:$0xff] }
  0xd1   : > { %981 = vmatpush.msrb.mxu2 %v735_v41  ;;  %1007 = vmatpush.msrb.mxu3 %v799_v42  ;;  %v1300_v41 = vld [vmem:[%s2445_s25 + $0x70] sm:$0xff]  ;;  %v1338_v42 = vld [vmem:[%s2445_s25 + $0x1a0] sm:$0xff] }
  0xd2   : > { %930 = vmatpush.msrb.mxu0 %v730_v43  ;;  %956 = vmatpush.msrb.mxu1 %v794_v44 }
  0xd3   : > { %982 = vmatpush.msrb.mxu2 %v731_v45  ;;  %1008 = vmatpush.msrb.mxu3 %v795_v46  ;;  %v1298_v45 = vld [vmem:[%s2445_s25 + $0x60] sm:$0xff]  ;;  %v1336_v46 = vld [vmem:[%s2445_s25 + $0x190] sm:$0xff] }
  0xd4   : > { %931 = vmatpush.msrb.mxu0 %v726_v47  ;;  %957 = vmatpush.msrb.mxu1 %v790_v48 }
  0xd5   : > { %983 = vmatpush.msrb.mxu2 %v727_v49  ;;  %1009 = vmatpush.msrb.mxu3 %v791_v50  ;;  %v1296_v49 = vld [vmem:[%s2445_s25 + $0x50] sm:$0xff]  ;;  %v1334_v50 = vld [vmem:[%s2445_s25 + $0x180] sm:$0xff] }
  0xd6   : > { %842 = vmatmul.f32.gmra.mxu0 %v2564_v37  ;;  %868 = vmatmul.f32.gmra.mxu1 %v2566_v38 }
  0xd7   : > { %894 = vmatmul.f32.gmra.mxu2 %v2564_v37  ;;  %920 = vmatmul.f32.gmra.mxu3 %v2566_v38 }
  0xd8   : > { %932 = vmatpush.msrb.mxu0 %v722_v51  ;;  %958 = vmatpush.msrb.mxu1 %v786_v52 }
  0xd9   : > { %984 = vmatpush.msrb.mxu2 %v723_v53  ;;  %1010 = vmatpush.msrb.mxu3 %v787_v54 }
  0xda   : > { %933 = vmatpush.msrb.mxu0 %v718_v55  ;;  %959 = vmatpush.msrb.mxu1 %v782_v56  ;;  %v1294_v55 = vld [vmem:[%s2445_s25 + $0x40] sm:$0xff]  ;;  %v1332_v56 = vld [vmem:[%s2445_s25 + $0x170] sm:$0xff] }
  0xdb   : > { %985 = vmatpush.msrb.mxu2 %v719_v57  ;;  %1011 = vmatpush.msrb.mxu3 %v783_v58 }
  0xdc   : > { %934 = vmatpush.msrb.mxu0 %v714_v59  ;;  %960 = vmatpush.msrb.mxu1 %v778_v60  ;;  %v1292_v59 = vld [vmem:[%s2445_s25 + $0x30] sm:$0xff]  ;;  %v1330_v60 = vld [vmem:[%s2445_s25 + $0x160] sm:$0xff] }
  0xdd   : > { %986 = vmatpush.msrb.mxu2 %v715_v61  ;;  %1012 = vmatpush.msrb.mxu3 %v779_v62  ;;  %v1290_v61 = vld [vmem:[%s2445_s25 + $0x20] sm:$0xff]  ;;  %v1328_v62 = vld [vmem:[%s2445_s25 + $0x150] sm:$0xff] }
  0xde   : > { %935 = vmatpush.msrb.mxu0 %v710_v63  ;;  %961 = vmatpush.msrb.mxu1 %v774_v0 }
  0xdf   : > { %987 = vmatpush.msrb.mxu2 %v711_v3  ;;  %1013 = vmatpush.msrb.mxu3 %v775_v4  ;;  %v1288_v4 = vld [vmem:[%s2445_s25 + $0x10] sm:$0xff] }
  0xe0   : > { %936 = vmatpush.msrb.mxu0 %v706_v5  ;;  %962 = vmatpush.msrb.mxu1 %v770_v6  ;;  %v1326_v5 = vld [vmem:[%s2445_s25 + $0x140] sm:$0xff] }
  0xe1   : > { %988 = vmatpush.msrb.mxu2 %v707_v7  ;;  %1014 = vmatpush.msrb.mxu3 %v771_v8 }
  0xe2   : > { %937 = vmatpush.msrb.mxu0 %v702_v9  ;;  %963 = vmatpush.msrb.mxu1 %v766_v10 }
  0xe3   : > { %989 = vmatpush.msrb.mxu2 %v703_v11  ;;  %1015 = vmatpush.msrb.mxu3 %v767_v12  ;;  %v1286_v11 = vld [vmem:[%s2445_s25] sm:$0xff]  ;;  %v1324_v12 = vld [vmem:[%s2445_s25 + $0x130] sm:$0xff] }
  0xe4   : > { %938 = vmatpush.msrb.mxu0 %v698_v13  ;;  %964 = vmatpush.msrb.mxu1 %v762_v14  ;;  %v1380_v14 = vld [vmem:[%s2445_s25 + $0x2f0] sm:$0xff] }
  0xe5   : > { %990 = vmatpush.msrb.mxu2 %v699_v15  ;;  %1016 = vmatpush.msrb.mxu3 %v763_v16  ;;  %v1317_v15 = vld [vmem:[%s2445_s25 + $0xf8] sm:$0xff] }
  0xe6   : > { %939 = vmatpush.msrb.mxu0 %v694_v17  ;;  %965 = vmatpush.msrb.mxu1 %v758_v18  ;;  %v1322_v17 = vld [vmem:[%s2445_s25 + $0x120] sm:$0xff] }
  0xe7   : > { %991 = vmatpush.msrb.mxu2 %v695_v21  ;;  %1017 = vmatpush.msrb.mxu3 %v759_v22  ;;  %v1378_v18 = vld [vmem:[%s2445_s25 + $0x2e0] sm:$0xff]  ;;  %v1315_v21 = vld [vmem:[%s2445_s25 + $0xe8] sm:$0xff] }
  0xe8   : > { %940 = vmatmul.f32.vlgmr.msrb.gmra.mxu0 %v2516_v1  ;;  %966 = vmatmul.f32.vlgmr.msrb.gmra.mxu1 %v2518_v2 }
  0xe9   : > { %992 = vmatmul.f32.vlgmr.msrb.gmra.mxu2 %v2516_v1  ;;  %1018 = vmatmul.f32.vlgmr.msrb.gmra.mxu3 %v2518_v2  ;;  %v1316_v1 = vld [vmem:[%s2445_s25 + $0xf0] sm:$0xff] }
  0xea   : > { %1414 = vmatpush.msra.mxu0 %v1316_v1  ;;  %1440 = vmatpush.msra.mxu1 %v1348_v25 }
  0xeb   : > { %1466 = vmatpush.msra.mxu2 %v1380_v14 }
  0xec   : > { %1415 = vmatpush.msra.mxu0 %v1314_v24  ;;  %v1376_v24 = vld [vmem:[%s2445_s25 + $0x2d0] sm:$0xff] }
  0xed   : > { %1467 = vmatpush.msra.mxu2 %v1378_v18  ;;  %v1400_v18 = vld [vmem:[%s2445_s25 + $0x390] sm:$0xff] }
  0xef   : > { %1468 = vmatpush.msra.mxu2 %v1376_v24  ;;  %v1299_v24 = vld [vmem:[%s2445_s25 + $0x68] sm:$0xff] }
  0xf0   : > { %943 = vmatmul.f32.gmra.mxu0 %v2540_v19  ;;  %969 = vmatmul.f32.gmra.mxu1 %v2542_v20 }
  0xf1   : > { %995 = vmatmul.f32.gmra.mxu2 %v2540_v19  ;;  %1021 = vmatmul.f32.gmra.mxu3 %v2542_v20  ;;  %v1312_v19 = vld [vmem:[%s2445_s25 + $0xd0] sm:$0xff]  ;;  %v1310_v20 = vld [vmem:[%s2445_s25 + $0xc0] sm:$0xff] }
  0xf2   : > { %1416 = vmatpush.msra.mxu0 %v1312_v19  ;;  %v1313_v19 = vld [vmem:[%s2445_s25 + $0xd8] sm:$0xff] }
  0xf3   : > { %v501_v2 = vpop.f32.mrf.mxu0  ;;  %v527_v23 = vpop.f32.mrf.mxu1 }
  0xf4   : > { %v2773_v26 = vadd.f32 %v527_v23, %v501_v2  ;;  %1417 = vmatpush.msra.mxu0 %v1310_v20  ;;  %v1320_v2 = vld [vmem:[%s2445_s25 + $0x110] sm:$0xff]  ;;  %v1318_v20 = vld [vmem:[%s2445_s25 + $0x100] sm:$0xff] }
  0xf6   : > { %v1803_v31 = vmul.f32 -1.442695, %v2773_v26 }
  0xf8   : > { %946 = vmatmul.f32.gmra.mxu0 %v2564_v37  ;;  %972 = vmatmul.f32.gmra.mxu1 %v2566_v38  ;;  %1938 = vpow2.f32 %v1803_v31 }
  0xf9   : > { %998 = vmatmul.f32.gmra.mxu2 %v2564_v37  ;;  %1024 = vmatmul.f32.gmra.mxu3 %v2566_v38  ;;  %v1308_v37 = vld [vmem:[%s2445_s25 + $0xb0] sm:$0xff]  ;;  %v1346_v38 = vld [vmem:[%s2445_s25 + $0x1e0] sm:$0xff] }
  0xfa   : > { %v553_v27 = vpop.f32.mrf.mxu2  ;;  %v579_v28 = vpop.f32.mrf.mxu3  ;;  %1418 = vmatpush.msra.mxu0 %v1308_v37  ;;  %1441 = vmatpush.msra.mxu1 %v1346_v38 }
  0xfb   : > { %v2782_v36 = vadd.f32 %v579_v28, %v553_v27  ;;  %v1374_v28 = vld [vmem:[%s2445_s25 + $0x2c0] sm:$0xff] }
  0xfc   : > { %1419 = vmatpush.msra.mxu0 %v1306_v29  ;;  %1442 = vmatpush.msra.mxu1 %v1344_v30  ;;  %v1412_v29 = vld [vmem:[%s2445_s25 + $0x3f0] sm:$0xff]  ;;  %v1311_v30 = vld [vmem:[%s2445_s25 + $0xc8] sm:$0xff] }
  0xfd   : > { %v504_v32 = vpop.f32.mrf.mxu0  ;;  %v530_v33 = vpop.f32.mrf.mxu1  ;;  %v1804_v43 = vmul.f32 -1.442695, %v2782_v36  ;;  %1469 = vmatpush.msra.mxu2 %v1374_v28  ;;  %1492 = vmatpush.msra.mxu3 %v1412_v29 }
  0xfe   : > { %1420 = vmatpush.msra.mxu0 %v1304_v34  ;;  %1443 = vmatpush.msra.mxu1 %v1342_v35  ;;  %v2789_v44 = vadd.f32 %v530_v33, %v504_v32  ;;  %v1939_v51 = vpop.eup %1938  ;;  %v1349_v32 = vld [vmem:[%s2445_s25 + $0x1f8] sm:$0xff]  ;;  %v1372_v33 = vld [vmem:[%s2445_s25 + $0x2b0] sm:$0xff]  ;;  %v1410_v34 = vld [vmem:[%s2445_s25 + $0x3e0] sm:$0xff] }
  0xff   : > { %1940 = vpow2.f32 %v1804_v43  ;;  %v2800_v58 = vadd.f32 1.0, %v1939_v51  ;;  %v1309_v35 = vld [vmem:[%s2445_s25 + $0xb8] sm:$0xff]  ;;  %1470 = vmatpush.msra.mxu2 %v1372_v33  ;;  %1493 = vmatpush.msra.mxu3 %v1410_v34  ;;  %v1347_v43 = vld [vmem:[%s2445_s25 + $0x1e8] sm:$0xff] }
 0x100   : > { %1421 = vmatpush.msra.mxu0 %v1302_v39  ;;  %1444 = vmatpush.msra.mxu1 %v1340_v40  ;;  %v1807_v52 = vmul.f32 -1.442695, %v2789_v44 }
 0x101   : > { %vm1081_vm0 = vweird.f32 %v2800_v58 }
 0x102   : > { %1422 = vmatpush.msra.mxu0 %v1300_v41  ;;  %1445 = vmatpush.msra.mxu1 %v1338_v42  ;;  %1942 = vpow2.f32 %v1807_v52  ;;  %v1368_v52 = vld [vmem:[%s2445_s25 + $0x290] sm:$0xff] }
 0x103   : > { %1944 = vrcp.f32 %v2800_v58 }
 0x104   : > { %v556_v47 = vpop.f32.mrf.mxu2  ;;  %v582_v48 = vpop.f32.mrf.mxu3  ;;  %1423 = vmatpush.msra.mxu0 %v1298_v45  ;;  %1446 = vmatpush.msra.mxu1 %v1336_v46 }
 0x105   : > { %v2798_v57 = vadd.f32 %v582_v48, %v556_v47  ;;  %v1941_v63 = vpop.eup %1940  ;;  %v1370_v47 = vld [vmem:[%s2445_s25 + $0x2a0] sm:$0xff]  ;;  %v1408_v48 = vld [vmem:[%s2445_s25 + $0x3d0] sm:$0xff] }
 0x106   : > { %1424 = vmatpush.msra.mxu0 %v1296_v49  ;;  %1447 = vmatpush.msra.mxu1 %v1334_v50  ;;  %v2812_v8 = vadd.f32 1.0, %v1941_v63  ;;  %v1307_v49 = vld [vmem:[%s2445_s25 + $0xa8] sm:$0xff]  ;;  %v1345_v50 = vld [vmem:[%s2445_s25 + $0x1d8] sm:$0xff]  ;;  %v1085_v63 = vand.u32 2147483647, %v2800_v58 }
 0x107   : > { %v507_v53 = vpop.f32.mrf.mxu0  ;;  %v533_v54 = vpop.f32.mrf.mxu1  ;;  %v1808_v0 = vmul.f32 -1.442695, %v2798_v57  ;;  %1471 = vmatpush.msra.mxu2 %v1370_v47  ;;  %1494 = vmatpush.msra.mxu3 %v1408_v48 }
 0x108   : > { %1425 = vmatpush.msra.mxu0 %v1294_v55  ;;  %1448 = vmatpush.msra.mxu1 %v1332_v56  ;;  %v2807_v3 = vadd.f32 %v533_v54, %v507_v53  ;;  %v1943_v16 = vpop.eup %1942  ;;  %v1406_v53 = vld [vmem:[%s2445_s25 + $0x3c0] sm:$0xff]  ;;  %v1305_v54 = vld [vmem:[%s2445_s25 + $0x98] sm:$0xff]  ;;  %v1343_v56 = vld [vmem:[%s2445_s25 + $0x1c8] sm:$0xff]  ;;  %vm2918_vm3 = vcmp.eq.f32.partialorder %v1085_v63, 8.507059e+37  ;;  %vm1096_vm4 = vweird.f32 %v2812_v8  ;;  %v1100_v33 = vand.u32 2147483647, %v2812_v8 }
 0x109   : > { %1946 = vpow2.f32 %v1808_v0  ;;  %v2826_v22 = vpop.eup %1944  ;;  %v2832_v23 = vadd.f32 1.0, %v1943_v16  ;;  %1472 = vmatpush.msra.mxu2 %v1368_v52  ;;  %1495 = vmatpush.msra.mxu3 %v1406_v53  ;;  %v1087_v0 = vand.u32 2147483648, %v2800_v58  ;;  %v1339_v16 = vld [vmem:[%s2445_s25 + $0x1a8] sm:$0xff] }
 0x10a   : > { %1426 = vmatpush.msra.mxu0 %v1292_v59  ;;  %1449 = vmatpush.msra.mxu1 %v1330_v60  ;;  %v1811_v13 = vmul.f32 -1.442695, %v2807_v3  ;;  %1948 = vrcp.f32 %v2812_v8  ;;  %v1077_v37 = vmul.f32 %v2826_v22, %v2800_v58  ;;  %vm1082_vm1 = vweird.f32 %v2826_v22  ;;  %v1398_v58 = vld [vmem:[%s2445_s25 + $0x380] sm:$0xff]  ;;  %v1379_v63 = vld [vmem:[%s2445_s25 + $0x2e8] sm:$0xff] }
 0x10b   : > { %vm2914_vm2 = vmor %vm1081_vm0, %vm1082_vm1  ;;  %v1088_v28 = vor.u32 1.1754944e-38, %v1087_v0  ;;  %vm2978_vm7 = vcmp.eq.f32.partialorder %v1100_v33, 8.507059e+37  ;;  %vm1141_vm8 = vweird.f32 %v2832_v23  ;;  %v1327_v33 = vld [vmem:[%s2445_s25 + $0x148] sm:$0xff] }
 0x10c   : > { %1427 = vmatpush.msra.mxu0 %v1290_v61  ;;  %1450 = vmatpush.msra.mxu1 %v1328_v62  ;;  %1950 = vpow2.f32 %v1811_v13  ;;  %v1078_v46 = vsub.f32 1.0, %v1077_v37  ;;  %v1366_v62 = vld [vmem:[%s2445_s25 + $0x280] sm:$0xff]  ;;  %v1301_v13 = vld [vmem:[%s2445_s25 + $0x78] sm:$0xff] }
 0x10d   : > { %1952 = vrcp.f32 %v2832_v23  ;;  %1473 = vmatpush.msra.mxu2 %v1366_v62 }
 0x10e   : > { %v559_v6 = vpop.f32.mrf.mxu2  ;;  %v585_v7 = vpop.f32.mrf.mxu3  ;;  %1428 = vmatpush.msra.mxu0 %v1288_v4  ;;  %1451 = vmatpush.msra.mxu1 %v1326_v5  ;;  %v1079_v60 = vmul.f32 %v2826_v22, %v1078_v46  ;;  %v1404_v4 = vld [vmem:[%s2445_s25 + $0x3b0] sm:$0xff]  ;;  %v1303_v5 = vld [vmem:[%s2445_s25 + $0x88] sm:$0xff]  ;;  %v1102_v46 = vand.u32 2147483648, %v2812_v8 }
 0x10f   : > { %v2829_v1 = vadd.f32 %v585_v7, %v559_v6  ;;  %v1947_v25 = vpop.eup %1946  ;;  %v1341_v6 = vld [vmem:[%s2445_s25 + $0x1b8] sm:$0xff]  ;;  %1496 = vmatpush.msra.mxu3 %v1404_v4 }
 0x110   : > { %1429 = vmatpush.msra.mxu0 %v1286_v11  ;;  %1452 = vmatpush.msra.mxu1 %v1324_v12  ;;  %v2852_v39 = vpop.eup %1948  ;;  %v2854_v40 = vadd.f32 1.0, %v1947_v25  ;;  %v1364_v11 = vld [vmem:[%s2445_s25 + $0x270] sm:$0xff]  ;;  %v1402_v12 = vld [vmem:[%s2445_s25 + $0x3a0] sm:$0xff]  ;;  %v1289_v25 = vld [vmem:[%s2445_s25 + $0x18] sm:$0xff] }
 0x111   : > { %v1812_v31 = vmul.f32 -1.442695, %v2829_v1  ;;  %v1092_v51 = vmul.f32 %v2852_v39, %v2812_v8  ;;  %1474 = vmatpush.msra.mxu2 %v1364_v11  ;;  %1497 = vmatpush.msra.mxu3 %v1402_v12  ;;  %vm1097_vm5 = vweird.f32 %v2852_v39  ;;  %v1103_v11 = vor.u32 1.1754944e-38, %v1102_v46  ;;  %v1287_v46 = vld [vmem:[%s2445_s25 + $0x8] sm:$0xff] }
 0x112   : > { %1518 = vmatpush.msrb.mxu0 %v1317_v15  ;;  %1453 = vmatpush.msra.mxu1 %v1322_v17  ;;  %v1951_v45 = vpop.eup %1950  ;;  %v1362_v17 = vld [vmem:[%s2445_s25 + $0x260] sm:$0xff]  ;;  %vm2974_vm6 = vmor %vm1096_vm4, %vm1097_vm5  ;;  %vm1156_vm12 = vweird.f32 %v2854_v40 }
 0x113   : > { %1954 = vpow2.f32 %v1812_v31  ;;  %v2871_v55 = vadd.f32 1.0, %v1951_v45  ;;  %v2874_v59 = vpop.eup %1952  ;;  %v1093_v7 = vsub.f32 1.0, %v1092_v51  ;;  %1475 = vmatpush.msra.mxu2 %v1362_v17  ;;  %v1360_v31 = vld [vmem:[%s2445_s25 + $0x250] sm:$0xff]  ;;  %1498 = vmatpush.msra.mxu3 %v1400_v18  ;;  %v1358_v45 = vld [vmem:[%s2445_s25 + $0x240] sm:$0xff]  ;;  %v1145_v18 = vand.u32 2147483647, %v2832_v23 }
 0x114   : > { %1519 = vmatpush.msrb.mxu0 %v1315_v21  ;;  %1454 = vmatpush.msra.mxu1 %v1320_v2  ;;  %1956 = vrcp.f32 %v2854_v40  ;;  %v2898_v15 = vmul.f32 %v2874_v59, %v2832_v23  ;;  %v1080_v21 = vadd.f32 %v2826_v22, %v1079_v60  ;;  %v1352_v17 = vld [vmem:[%s2445_s25 + $0x210] sm:$0xff]  ;;  %vm1142_vm9 = vweird.f32 %v2874_v59 }
 0x115   : > { %1958 = vrcp.f32 %v2871_v55  ;;  %1476 = vmatpush.msra.mxu2 %v1360_v31  ;;  %1499 = vmatpush.msra.mxu3 %v1398_v58  ;;  %v1160_v58 = vand.u32 2147483647, %v2854_v40  ;;  %vm3026_vm10 = vmor %vm1141_vm8, %vm1142_vm9  ;;  %vm3038_vm11 = vcmp.eq.f32.partialorder %v1145_v18, 8.507059e+37  ;;  %vm1201_vm0 = vweird.f32 %v2871_v55  ;;  %v1377_v18 = vld [vmem:[%s2445_s25 + $0x2d8] sm:$0xff] }
 0x116   : > { %1520 = vmatpush.msrb.mxu0 %v1313_v19  ;;  %1455 = vmatpush.msra.mxu1 %v1318_v20  ;;  %v1337_v19 = vld [vmem:[%s2445_s25 + $0x198] sm:$0xff]  ;;  %v1138_v47 = vsub.f32 1.0, %v2898_v15  ;;  %v1084_v51 = vsel %vm2914_vm2, %v2826_v22, %v1080_v21  ;;  %v1394_v22 = vld [vmem:[%s2445_s25 + $0x360] sm:$0xff]  ;;  %v1147_v21 = vand.u32 2147483648, %v2832_v23  ;;  %v1371_v23 = vld [vmem:[%s2445_s25 + $0x2a8] sm:$0xff] }
 0x117   : > { %1477 = vmatpush.msra.mxu2 %v1358_v45  ;;  %v1089_v62 = vsel %vm2918_vm3, %v1088_v28, %v1084_v51  ;;  %v1325_v51 = vld [vmem:[%s2445_s25 + $0x138] sm:$0xff]  ;;  %vm3055_vm14 = vcmp.eq.f32.partialorder %v1160_v58, 8.507059e+37 }
 0x118   : > { %1521 = vmatpush.msrb.mxu0 %v1311_v30  ;;  %1544 = vmatpush.msrb.mxu1 %v1349_v32  ;;  %v1094_v32 = vmul.f32 %v2852_v39, %v1093_v7  ;;  %v1139_v4 = vmul.f32 %v2874_v59, %v1138_v47  ;;  %v1291_v7 = vld [vmem:[%s2445_s25 + $0x28] sm:$0xff]  ;;  %v1256_v28 = vmul.f32 %v1089_v62, %v2773_v26 }
 0x119   : > { %v2814_v9 = vpop.f32.mrf.mxu0  ;;  %v2816_v10 = vpop.f32.mrf.mxu1 }
 0x11a   : > { %1522 = vmatpush.msrb.mxu0 %v1309_v35  ;;  %1545 = vmatpush.msrb.mxu1 %v1347_v43  ;;  %v2879_v61 = vadd.f32 %v2816_v10, %v2814_v9  ;;  %v1955_v14 = vpop.eup %1954  ;;  %v1297_v35 = vld [vmem:[%s2445_s25 + $0x58] sm:$0xff]  ;;  %v1335_v43 = vld [vmem:[%s2445_s25 + $0x188] sm:$0xff]  ;;  %v2963_v60 = vadd.f32 %v2852_v39, %v1094_v32  ;;  %v1162_v32 = vand.u32 2147483648, %v2854_v40 }
 0x11b   : > { %v2908_v20 = vpop.eup %1956  ;;  %v2931_v34 = vadd.f32 1.0, %v1955_v14 }
 0x11c   : > { %1523 = vmatpush.msrb.mxu0 %v1307_v49  ;;  %1546 = vmatpush.msrb.mxu1 %v1345_v50  ;;  %v1805_v2 = vmul.f32 -1.442695, %v2879_v61  ;;  %v1396_v49 = vld [vmem:[%s2445_s25 + $0x370] sm:$0xff]  ;;  %v1295_v50 = vld [vmem:[%s2445_s25 + $0x48] sm:$0xff]  ;;  %v2950_v52 = vmul.f32 %v2908_v20, %v2854_v40  ;;  %v2957_v53 = vpop.eup %1958  ;;  %v1099_v31 = vsel %vm2974_vm6, %v2852_v39, %v2963_v60  ;;  %vm1157_vm13 = vweird.f32 %v2908_v20 }
 0x11d   : > { %1500 = vmatpush.msra.mxu3 %v1396_v49  ;;  %v2989_v12 = vmul.f32 %v2957_v53, %v2871_v55  ;;  %v1388_v39 = vld [vmem:[%s2445_s25 + $0x330] sm:$0xff]  ;;  %vm3074_vm15 = vmor %vm1156_vm12, %vm1157_vm13  ;;  %vm1202_vm1 = vweird.f32 %v2957_v53  ;;  %v1205_v40 = vand.u32 2147483647, %v2871_v55  ;;  %v1411_v49 = vld [vmem:[%s2445_s25 + $0x3e8] sm:$0xff]  ;;  %vm1216_vm4 = vweird.f32 %v2931_v34 }
 0x11e   : > { %1524 = vmatpush.msrb.mxu0 %v1305_v54  ;;  %1547 = vmatpush.msrb.mxu1 %v1343_v56  ;;  %1960 = vpow2.f32 %v1805_v2  ;;  %v1356_v54 = vld [vmem:[%s2445_s25 + $0x230] sm:$0xff]  ;;  %v1293_v56 = vld [vmem:[%s2445_s25 + $0x38] sm:$0xff]  ;;  %v1153_v8 = vsub.f32 1.0, %v2950_v52  ;;  %vm3107_vm2 = vmor %vm1201_vm0, %vm1202_vm1 }
 0x11f   : > { %1962 = vrcp.f32 %v2931_v34  ;;  %1478 = vmatpush.msra.mxu2 %v1356_v54  ;;  %1501 = vmatpush.msra.mxu3 %v1394_v22  ;;  %v1381_v52 = vld [vmem:[%s2445_s25 + $0x2f8] sm:$0xff]  ;;  %v1386_v22 = vld [vmem:[%s2445_s25 + $0x320] sm:$0xff]  ;;  %vm3129_vm3 = vcmp.eq.f32.partialorder %v1205_v40, 8.507059e+37 }
 0x120   : > { %v2839_v38 = vpop.f32.mrf.mxu2  ;;  %v2841_v27 = vpop.f32.mrf.mxu3  ;;  %1525 = vmatpush.msrb.mxu0 %v1303_v5  ;;  %1548 = vmatpush.msrb.mxu1 %v1341_v6  ;;  %v1392_v6 = vld [vmem:[%s2445_s25 + $0x350] sm:$0xff] }
 0x121   : > { %v2941_v48 = vadd.f32 %v2841_v27, %v2839_v38  ;;  %v1333_v27 = vld [vmem:[%s2445_s25 + $0x178] sm:$0xff]  ;;  %1502 = vmatpush.msra.mxu3 %v1392_v6 }
 0x122   : > { %1526 = vmatpush.msrb.mxu0 %v1301_v13  ;;  %1549 = vmatpush.msrb.mxu1 %v1339_v16  ;;  %v1329_v16 = vld [vmem:[%s2445_s25 + $0x158] sm:$0xff] }
 0x123   : > { %v2856_v41 = vpop.f32.mrf.mxu0  ;;  %v2858_v42 = vpop.f32.mrf.mxu1  ;;  %v1806_v5 = vmul.f32 -1.442695, %v2941_v48 }
 0x124   : > { %1527 = vmatpush.msrb.mxu0 %v1299_v24  ;;  %1550 = vmatpush.msrb.mxu1 %v1337_v19  ;;  %v2954_v38 = vadd.f32 %v2858_v42, %v2856_v41  ;;  %v1331_v41 = vld [vmem:[%s2445_s25 + $0x168] sm:$0xff]  ;;  %v1354_v42 = vld [vmem:[%s2445_s25 + $0x220] sm:$0xff]  ;;  %v1961_v37 = vpop.eup %1960 }
 0x125   : > { %1479 = vmatpush.msra.mxu2 %v1354_v42  ;;  %v1390_v19 = vld [vmem:[%s2445_s25 + $0x340] sm:$0xff]  ;;  %1964 = vpow2.f32 %v1806_v5  ;;  %v3020_v47 = vpop.eup %1962  ;;  %v3042_v54 = vadd.f32 1.0, %v1961_v37 }
 0x126   : > { %1528 = vmatpush.msrb.mxu0 %v1297_v35  ;;  %1551 = vmatpush.msrb.mxu1 %v1335_v43  ;;  %v1809_v13 = vmul.f32 -1.442695, %v2954_v38  ;;  %v1350_v35 = vld [vmem:[%s2445_s25 + $0x200] sm:$0xff]  ;;  %v1140_v43 = vadd.f32 %v2874_v59, %v1139_v4  ;;  %v1212_v42 = vmul.f32 %v3020_v47, %v2931_v34  ;;  %v1163_v4 = vor.u32 1.1754944e-38, %v1162_v32  ;;  %v1319_v32 = vld [vmem:[%s2445_s25 + $0x108] sm:$0xff] }
 0x127   : > { %1480 = vmatpush.msra.mxu2 %v1352_v17  ;;  %1503 = vmatpush.msra.mxu3 %v1390_v19  ;;  %v1375_v19 = vld [vmem:[%s2445_s25 + $0x2c8] sm:$0xff]  ;;  %vm1217_vm5 = vweird.f32 %v3020_v47  ;;  %vm1111_vm8 = vweird.f32 %v3042_v54 }
 0x128   : > { %1529 = vmatpush.msrb.mxu0 %v1295_v50  ;;  %1552 = vmatpush.msrb.mxu1 %v1333_v27  ;;  %v1154_v50 = vmul.f32 %v2908_v20, %v1153_v8  ;;  %1966 = vpow2.f32 %v1809_v13  ;;  %v1148_v27 = vor.u32 1.1754944e-38, %v1147_v21  ;;  %v1144_v60 = vsel %vm3026_vm10, %v2874_v59, %v1140_v43  ;;  %v1321_v8 = vld [vmem:[%s2445_s25 + $0x118] sm:$0xff]  ;;  %vm3154_vm6 = vmor %vm1216_vm4, %vm1217_vm5 }
 0x129   : > { %1481 = vmatpush.msra.mxu2 %v1350_v35  ;;  %1504 = vmatpush.msra.mxu3 %v1388_v39  ;;  %1968 = vrcp.f32 %v3042_v54 }
 0x12a   : > { %v2889_v9 = vpop.f32.mrf.mxu2  ;;  %v2891_v10 = vpop.f32.mrf.mxu3  ;;  %1530 = vmatpush.msrb.mxu0 %v1293_v56  ;;  %1553 = vmatpush.msrb.mxu1 %v1331_v41  ;;  %v1323_v56 = vld [vmem:[%s2445_s25 + $0x128] sm:$0xff]  ;;  %v1155_v0 = vadd.f32 %v2908_v20, %v1154_v50 }
 0x12b   : > { %v3016_v26 = vadd.f32 %v2891_v10, %v2889_v9  ;;  %v1198_v9 = vsub.f32 1.0, %v2989_v12  ;;  %1570 = vmatpush.msrb.mxu2 %v1381_v52  ;;  %1505 = vmatpush.msra.mxu3 %v1386_v22  ;;  %v1965_v12 = vpop.eup %1964 }
 0x12c   : > { %1531 = vmatpush.msrb.mxu0 %v1291_v7  ;;  %1554 = vmatpush.msrb.mxu1 %v1329_v16  ;;  %v1159_v35 = vsel %vm3074_vm15, %v2908_v20, %v1155_v0 }
 0x12d   : > { %v2922_v29 = vpop.f32.mrf.mxu0  ;;  %v2924_v30 = vpop.f32.mrf.mxu1  ;;  %v1810_v62 = vmul.f32 -1.442695, %v3016_v26  ;;  %v1199_v5 = vmul.f32 %v2957_v53, %v1198_v9  ;;  %1571 = vmatpush.msrb.mxu2 %v1379_v63  ;;  %v1222_v63 = vand.u32 2147483648, %v2931_v34 }
 0x12e   : > { %v3034_v10 = vadd.f32 %v2924_v30, %v2922_v29  ;;  %1532 = vmatpush.msrb.mxu0 %v1289_v25  ;;  %1555 = vmatpush.msrb.mxu1 %v1327_v33  ;;  %v1104_v29 = vsel %vm2978_vm7, %v1103_v11, %v1099_v31  ;;  %v1384_v11 = vld [vmem:[%s2445_s25 + $0x310] sm:$0xff]  ;;  %v1967_v21 = vpop.eup %1966  ;;  %v1213_v25 = vsub.f32 1.0, %v1212_v42  ;;  %v1413_v33 = vld [vmem:[%s2445_s25 + $0x3f8] sm:$0xff] }
 0x12f   : > { %v1257_v13 = vmul.f32 %v1104_v29, %v2782_v36  ;;  %v1149_v36 = vsel %vm3038_vm11, %v1148_v27, %v1144_v60  ;;  %1506 = vmatpush.msra.mxu3 %v1384_v11  ;;  %1970 = vpow2.f32 %v1810_v62  ;;  %1572 = vmatpush.msrb.mxu2 %v1377_v18  ;;  %v1200_v43 = vadd.f32 %v2957_v53, %v1199_v5  ;;  %v1409_v27 = vld [vmem:[%s2445_s25 + $0x3d8] sm:$0xff] }
 0x130   : > { %1533 = vmatpush.msrb.mxu0 %v1287_v46  ;;  %1556 = vmatpush.msrb.mxu1 %v1325_v51  ;;  %v1813_v59 = vmul.f32 -1.442695, %v3034_v10  ;;  %v3111_v39 = vadd.f32 1.0, %v1967_v21  ;;  %v1373_v46 = vld [vmem:[%s2445_s25 + $0x2b8] sm:$0xff]  ;;  %v1214_v9 = vmul.f32 %v3020_v47, %v1213_v25  ;;  %v1220_v62 = vand.u32 2147483647, %v2931_v34 }
 0x131   : > { %1573 = vmatpush.msrb.mxu2 %v1375_v19  ;;  %v1204_v22 = vsel %vm3107_vm2, %v2957_v53, %v1200_v43  ;;  %v1369_v60 = vld [vmem:[%s2445_s25 + $0x298] sm:$0xff]  ;;  %v1407_v53 = vld [vmem:[%s2445_s25 + $0x3c8] sm:$0xff] }
 0x132   : > { %1557 = vmatpush.msrb.mxu1 %v1323_v56  ;;  %1972 = vpow2.f32 %v1813_v59  ;;  %v1405_v11 = vld [vmem:[%s2445_s25 + $0x3b8] sm:$0xff]  ;;  %vm1221_vm7 = vcmp.eq.f32.partialorder %v1220_v62, 8.507059e+37 }
 0x133   : > { %1574 = vmatpush.msrb.mxu2 %v1373_v46  ;;  %v1365_v21 = vld [vmem:[%s2445_s25 + $0x278] sm:$0xff]  ;;  %v1359_v46 = vld [vmem:[%s2445_s25 + $0x248] sm:$0xff] }
 0x134   : > { %v2992_v14 = vpop.f32.mrf.mxu2  ;;  %v2994_v15 = vpop.f32.mrf.mxu3  ;;  %1558 = vmatpush.msrb.mxu1 %v1321_v8  ;;  %v1357_v29 = vld [vmem:[%s2445_s25 + $0x238] sm:$0xff] }
 0x135   : > { %v3090_v37 = vadd.f32 %v2994_v15, %v2992_v14  ;;  %v1260_v14 = vmul.f32 %v1149_v36, %v2789_v44  ;;  %v3116_v44 = vpop.eup %1968  ;;  %1575 = vmatpush.msrb.mxu2 %v1371_v23  ;;  %v1403_v36 = vld [vmem:[%s2445_s25 + $0x3a8] sm:$0xff]  ;;  %v1117_v23 = vand.u32 2147483648, %v3042_v54 }
 0x136   : > { %1559 = vmatpush.msrb.mxu1 %v1319_v32  ;;  %v1971_v56 = vpop.eup %1970  ;;  %v1107_v0 = vmul.f32 %v3116_v44, %v3042_v54  ;;  %v1401_v32 = vld [vmem:[%s2445_s25 + $0x398] sm:$0xff]  ;;  %vm1112_vm9 = vweird.f32 %v3116_v44 }
 0x137   : > { %v1814_v51 = vmul.f32 -1.442695, %v3090_v37  ;;  %1576 = vmatpush.msrb.mxu2 %v1369_v60  ;;  %vm3209_vm10 = vmor %vm1111_vm8, %vm1112_vm9 }
 0x138   : > { %v1973_v41 = vpop.eup %1972 }
 0x13f   : > { %v837_v2 = vpop.f32.mrf.mxu0  ;;  %v863_v24 = vpop.f32.mrf.mxu1 }
 0x140   : > { %v864_v45 = vadd.f32 %v863_v24, %v837_v2  ;;  %v1207_v2 = vand.u32 2147483648, %v2871_v55  ;;  %v1382_v24 = vld [vmem:[%s2445_s25 + $0x300] sm:$0xff]  ;;  %v1164_v55 = vsel %vm3055_vm14, %v1163_v4, %v1159_v35  ;;  %vm1171_vm14 = vweird.f32 %v3111_v39 }
 0x141   : > { %1507 = vmatpush.msra.mxu3 %v1382_v24  ;;  %v1261_v42 = vmul.f32 %v1164_v55, %v2798_v57  ;;  %v1367_v57 = vld [vmem:[%s2445_s25 + $0x288] sm:$0xff]  ;;  %v1108_v24 = vsub.f32 1.0, %v1107_v0 }
 0x142   : > { %v3049_v30 = vmul.f32 %v1256_v28, %v864_v45  ;;  %v3100_v45 = vadd.f32 1.0, %v1965_v12  ;;  %v1208_v50 = vor.u32 1.1754944e-38, %v1207_v2  ;;  %v3158_v12 = vadd.f32 1.0, %v1971_v56  ;;  %1577 = vmatpush.msrb.mxu2 %v1367_v57  ;;  %v1395_v56 = vld [vmem:[%s2445_s25 + $0x368] sm:$0xff] }
 0x143   : > { %1596 = vmatpush.msrb.mxu3 %v1413_v33  ;;  %v1223_v2 = vor.u32 1.1754944e-38, %v1222_v63  ;;  %v1361_v33 = vld [vmem:[%s2445_s25 + $0x258] sm:$0xff]  ;;  %v1109_v15 = vmul.f32 %v3116_v44, %v1108_v24  ;;  %v1355_v0 = vld [vmem:[%s2445_s25 + $0x228] sm:$0xff] }
 0x144   : > { %1430 = vmatmul.f32.vlgmr.msra.gmra.mxu0 %v3049_v30  ;;  %1974 = vrcp.f32 %v3100_v45  ;;  %v1209_v59 = vsel %vm3129_vm3, %v1208_v50, %v1204_v22  ;;  %1578 = vmatpush.msrb.mxu2 %v1365_v21  ;;  %vm1126_vm12 = vweird.f32 %v3100_v45  ;;  %v1130_v21 = vand.u32 2147483647, %v3100_v45  ;;  %v1387_v24 = vld [vmem:[%s2445_s25 + $0x328] sm:$0xff] }
 0x145   : > { %1597 = vmatpush.msrb.mxu3 %v1411_v49  ;;  %1976 = vrcp.f32 %v3111_v39  ;;  %v1264_v34 = vmul.f32 %v1209_v59, %v2807_v3  ;;  %v1397_v49 = vld [vmem:[%s2445_s25 + $0x378] sm:$0xff]  ;;  %v1118_v59 = vor.u32 1.1754944e-38, %v1117_v23  ;;  %vm1186_vm4 = vweird.f32 %v3158_v12 }
 0x146   : > { %v889_v6 = vpop.f32.mrf.mxu2  ;;  %v915_v7 = vpop.f32.mrf.mxu3  ;;  %1978 = vpow2.f32 %v1814_v51  ;;  %vm3262_vm2 = vcmp.eq.f32.partialorder %v1130_v21, 8.507059e+37 }
 0x147   : > { %v916_v17 = vadd.f32 %v915_v7, %v889_v6  ;;  %1598 = vmatpush.msrb.mxu3 %v1409_v27  ;;  %v1215_v6 = vadd.f32 %v3020_v47, %v1214_v9  ;;  %1980 = vrcp.f32 %v3158_v12 }
 0x149   : > { %v3092_v28 = vmul.f32 %v1257_v13, %v916_v17  ;;  %v840_v31 = vpop.f32.mrf.mxu0  ;;  %v866_v58 = vpop.f32.mrf.mxu1  ;;  %1599 = vmatpush.msrb.mxu3 %v1407_v53  ;;  %v3160_v13 = vadd.f32 1.0, %v1973_v41  ;;  %v1110_v53 = vadd.f32 %v3116_v44, %v1109_v15  ;;  %v1115_v41 = vand.u32 2147483647, %v3042_v54 }
 0x14a   : > { %v867_v20 = vadd.f32 %v866_v58, %v840_v31  ;;  %v3166_v40 = vpop.eup %1974  ;;  %v1219_v31 = vsel %vm3154_vm6, %v3020_v47, %v1215_v6  ;;  %v1363_v58 = vld [vmem:[%s2445_s25 + $0x268] sm:$0xff] }
 0x14b   : > { %1456 = vmatmul.f32.vlgmr.msra.gmra.mxu1 %v3092_v28  ;;  %1600 = vmatpush.msrb.mxu3 %v1405_v11  ;;  %v3169_v25 = vpop.eup %1976  ;;  %v1122_v43 = vmul.f32 %v3166_v40, %v3100_v45  ;;  %1982 = vrcp.f32 %v3160_v13  ;;  %v1399_v47 = vld [vmem:[%s2445_s25 + $0x388] sm:$0xff]  ;;  %v1114_v57 = vsel %vm3209_vm10, %v3116_v44, %v1110_v53  ;;  %vm1116_vm11 = vcmp.eq.f32.partialorder %v1115_v41, 8.507059e+37 }
 0x14c   : > { %v3122_v52 = vmul.f32 %v1260_v14, %v867_v20  ;;  %v1979_v35 = vpop.eup %1978  ;;  %1579 = vmatpush.msrb.mxu2 %v1363_v58  ;;  %v1224_v14 = vsel %vm1221_vm7, %v1223_v2, %v1219_v31  ;;  %v1167_v20 = vmul.f32 %v3169_v25, %v3111_v39  ;;  %vm1127_vm13 = vweird.f32 %v3166_v40 }
 0x14d   : > { %1601 = vmatpush.msrb.mxu3 %v1403_v36  ;;  %v3193_v50 = vadd.f32 1.0, %v1979_v35  ;;  %v1265_v51 = vmul.f32 %v1224_v14, %v2829_v1  ;;  %v1123_v27 = vsub.f32 1.0, %v1122_v43  ;;  %v3199_v60 = vpop.eup %1980  ;;  %v1132_v44 = vand.u32 2147483648, %v3100_v45  ;;  %vm3248_vm0 = vmor %vm1126_vm12, %vm1127_vm13  ;;  %v1385_v45 = vld [vmem:[%s2445_s25 + $0x318] sm:$0xff] }
 0x14e   : > { %1433 = vmatmul.f32.gmra.mxu0 %v3122_v52  ;;  %1580 = vmatpush.msrb.mxu2 %v1361_v33  ;;  %v1182_v54 = vmul.f32 %v3199_v60, %v3158_v12  ;;  %vm1172_vm15 = vweird.f32 %v3169_v25  ;;  %vm1187_vm5 = vweird.f32 %v3199_v60  ;;  %vm1231_vm6 = vweird.f32 %v3160_v13 }
 0x14f   : > { %1602 = vmatpush.msrb.mxu3 %v1401_v32  ;;  %1984 = vrcp.f32 %v3193_v50  ;;  %v1124_v6 = vmul.f32 %v3166_v40, %v1123_v27  ;;  %v1175_v32 = vand.u32 2147483647, %v3111_v39  ;;  %vm3256_vm1 = vmor %vm1171_vm14, %vm1172_vm15  ;;  %vm1246_vm12 = vweird.f32 %v3193_v50 }
 0x150   : > { %v892_v4 = vpop.f32.mrf.mxu2  ;;  %v918_v5 = vpop.f32.mrf.mxu3  ;;  %1581 = vmatpush.msrb.mxu2 %v1359_v46  ;;  %v1183_v2 = vsub.f32 1.0, %v1182_v54  ;;  %vm3292_vm8 = vmor %vm1186_vm4, %vm1187_vm5 }
 0x151   : > { %v919_v7 = vadd.f32 %v918_v5, %v892_v4  ;;  %1603 = vmatpush.msrb.mxu3 %v1399_v47  ;;  %v3203_v1 = vpop.eup %1982  ;;  %v1393_v4 = vld [vmem:[%s2445_s25 + $0x358] sm:$0xff]  ;;  %v1125_v36 = vadd.f32 %v3166_v40, %v1124_v6  ;;  %vm1176_vm3 = vcmp.eq.f32.partialorder %v1175_v32, 8.507059e+37 }
 0x152   : > { %1582 = vmatpush.msrb.mxu2 %v1357_v29  ;;  %v1353_v5 = vld [vmem:[%s2445_s25 + $0x218] sm:$0xff]  ;;  %v1227_v8 = vmul.f32 %v3203_v1, %v3160_v13  ;;  %vm1232_vm7 = vweird.f32 %v3203_v1  ;;  %v1237_v29 = vand.u32 2147483648, %v3160_v13 }
 0x153   : > { %v843_v16 = vpop.f32.mrf.mxu0  ;;  %v869_v17 = vpop.f32.mrf.mxu1  ;;  %v3162_v18 = vmul.f32 %v1261_v42, %v919_v7  ;;  %v1168_v42 = vsub.f32 1.0, %v1167_v20  ;;  %1604 = vmatpush.msrb.mxu3 %v1397_v49  ;;  %v1391_v7 = vld [vmem:[%s2445_s25 + $0x348] sm:$0xff]  ;;  %v1133_v20 = vor.u32 1.1754944e-38, %v1132_v44  ;;  %vm3299_vm9 = vmor %vm1231_vm6, %vm1232_vm7  ;;  %v1250_v44 = vand.u32 2147483647, %v3193_v50 }
 0x154   : > { %v870_v19 = vadd.f32 %v869_v17, %v843_v16  ;;  %1583 = vmatpush.msrb.mxu2 %v1355_v0  ;;  %v1351_v16 = vld [vmem:[%s2445_s25 + $0x208] sm:$0xff]  ;;  %v1389_v17 = vld [vmem:[%s2445_s25 + $0x338] sm:$0xff]  ;;  %v1228_v33 = vsub.f32 1.0, %v1227_v8 }
 0x155   : > { %1459 = vmatmul.f32.gmra.mxu1 %v3162_v18  ;;  %1605 = vmatpush.msrb.mxu3 %v1395_v56  ;;  %v1169_v11 = vmul.f32 %v3169_v25, %v1168_v42  ;;  %vm1251_vm15 = vcmp.eq.f32.partialorder %v1250_v44, 8.507059e+37 }
 0x156   : > { %v3178_v3 = vmul.f32 %v1264_v34, %v870_v19  ;;  %1584 = vmatpush.msrb.mxu2 %v1353_v5  ;;  %v1177_v34 = vand.u32 2147483648, %v3111_v39  ;;  %v3242_v19 = vpop.eup %1984  ;;  %v1129_v39 = vsel %vm3248_vm0, %v3166_v40, %v1125_v36  ;;  %v1229_v23 = vmul.f32 %v3203_v1, %v1228_v33 }
 0x157   : > { %1606 = vmatpush.msrb.mxu3 %v1393_v4  ;;  %v1170_v58 = vadd.f32 %v3169_v25, %v1169_v11  ;;  %v1190_v40 = vand.u32 2147483647, %v3158_v12  ;;  %v1238_v11 = vor.u32 1.1754944e-38, %v1237_v29  ;;  %vm1247_vm13 = vweird.f32 %v3242_v19 }
 0x158   : > { %1436 = vmatmul.f32.gmra.mxu0 %v3178_v3  ;;  %1585 = vmatpush.msrb.mxu2 %v1351_v16  ;;  %v1178_v49 = vor.u32 1.1754944e-38, %v1177_v34  ;;  %v1230_v41 = vadd.f32 %v3203_v1, %v1229_v23  ;;  %vm3318_vm14 = vmor %vm1246_vm12, %vm1247_vm13 }
 0x159   : > { %1607 = vmatpush.msrb.mxu3 %v1391_v7  ;;  %vm1191_vm10 = vcmp.eq.f32.partialorder %v1190_v40, 8.507059e+37 }
 0x15a   : > { %v895_v55 = vpop.f32.mrf.mxu2  ;;  %v921_v9 = vpop.f32.mrf.mxu3  ;;  %v1234_v16 = vsel %vm3299_vm9, %v3203_v1, %v1230_v41 }
 0x15b   : > { %v922_v22 = vadd.f32 %v921_v9, %v895_v55  ;;  %1608 = vmatpush.msrb.mxu3 %v1389_v17  ;;  %v1184_v55 = vmul.f32 %v3199_v60, %v1183_v2  ;;  %v1242_v9 = vmul.f32 %v3242_v19, %v3193_v50 }
 0x15d   : > { %v3213_v63 = vmul.f32 %v1265_v51, %v922_v22  ;;  %1609 = vmatpush.msrb.mxu3 %v1387_v24  ;;  %v1174_v51 = vsel %vm3256_vm1, %v3169_v25, %v1170_v58  ;;  %v1192_v22 = vand.u32 2147483648, %v3158_v12  ;;  %v1185_v25 = vadd.f32 %v3199_v60, %v1184_v55  ;;  %v1280_v55 = vld [vmem:[#allocation2 + $0x28] sm:$0xff] }
 0x15e   : > { %v1243_v56 = vsub.f32 1.0, %v1242_v9  ;;  %v1235_v12 = vand.u32 2147483647, %v3160_v13 }
 0x15f   : > { %1462 = vmatmul.f32.gmra.mxu1 %v3213_v63  ;;  %1610 = vmatpush.msrb.mxu3 %v1385_v45  ;;  %v1193_v7 = vor.u32 1.1754944e-38, %v1192_v22  ;;  %v1189_v13 = vsel %vm3292_vm8, %v3199_v60, %v1185_v25  ;;  %v1252_v60 = vand.u32 2147483648, %v3193_v50  ;;  %v1282_v22 = vld [vmem:[#allocation2 + $0x8] sm:$0xff] }
 0x160   : > { %1534 = vmatmul.f32.vlgmr.msrb.gmra.mxu0 %v3049_v30  ;;  %v1119_v30 = vsel %vm1116_vm11, %v1118_v59, %v1114_v57  ;;  %v1244_v8 = vmul.f32 %v3242_v19, %v1243_v56  ;;  %vm1236_vm11 = vcmp.eq.f32.partialorder %v1235_v12, 8.507059e+37 }
 0x161   : > { %v1258_v14 = vmul.f32 %v1119_v30, %v2879_v61  ;;  %v1383_v61 = vld [vmem:[%s2445_s25 + $0x308] sm:$0xff]  ;;  %v1239_v21 = vsel %vm1236_vm11, %v1238_v11, %v1234_v16  ;;  %v1253_v58 = vor.u32 1.1754944e-38, %v1252_v60  ;;  %v1283_v60 = vld [vmem:[#allocation2] sm:$0xff] }
 0x162   : > { %1611 = vmatpush.msrb.mxu3 %v1383_v61  ;;  %v1266_v31 = vmul.f32 %v1239_v21, %v3034_v10 }
 0x165   : > { %v941_v43 = vpop.f32.mrf.mxu0  ;;  %v967_v47 = vpop.f32.mrf.mxu1 }
 0x166   : > { %v968_v46 = vadd.f32 %v967_v47, %v941_v43 }
 0x167   : > { %1560 = vmatmul.f32.vlgmr.msrb.gmra.mxu1 %v3092_v28  ;;  %v1134_v28 = vsel %vm3262_vm2, %v1133_v20, %v1129_v39 }
 0x168   : > { %v3278_v27 = vmul.f32 %v1258_v14, %v968_v46  ;;  %1537 = vmatmul.f32.gmra.mxu0 %v3122_v52  ;;  %v1179_v52 = vsel %vm1176_vm3, %v1178_v49, %v1174_v51  ;;  %v1259_v0 = vmul.f32 %v1134_v28, %v2941_v48 }
 0x169   : > { %v1262_v54 = vmul.f32 %v1179_v52, %v2954_v38  ;;  %v1194_v38 = vsel %vm1191_vm10, %v1193_v7, %v1189_v13 }
 0x16a   : > { %1482 = vmatmul.f32.vlgmr.msra.gmra.mxu2 %v3278_v27  ;;  %v1263_v36 = vmul.f32 %v1194_v38, %v3016_v26 }
 0x16c   : > { %v993_v42 = vpop.f32.mrf.mxu2  ;;  %v1019_v62 = vpop.f32.mrf.mxu3 }
 0x16d   : > { %v1020_v5 = vadd.f32 %v1019_v62, %v993_v42  ;;  %v944_v59 = vpop.f32.mrf.mxu0  ;;  %v970_v6 = vpop.f32.mrf.mxu1  ;;  %v1284_v62 = vld [vmem:[#allocation2 + $0x18] sm:$0xff] }
 0x16e   : > { %v971_v57 = vadd.f32 %v970_v6, %v944_v59 }
 0x16f   : > { %v1271_v48 = vmul.f32 %v1259_v0, %v1020_v5  ;;  %1563 = vmatmul.f32.gmra.mxu1 %v3162_v18  ;;  %v1245_v18 = vadd.f32 %v3242_v19, %v1244_v8 }
 0x170   : > { %v1274_v17 = vmul.f32 %v1262_v54, %v971_v57  ;;  %1540 = vmatmul.f32.gmra.mxu0 %v3178_v3  ;;  %v1281_v57 = vld [vmem:[#allocation2 + $0x10] sm:$0xff] }
 0x171   : > { %1508 = vmatmul.f32.vlgmr.msra.gmra.mxu3 %v1271_v48  ;;  %v1249_v33 = vsel %vm3318_vm14, %v3242_v19, %v1245_v18 }
 0x172   : > { %1485 = vmatmul.f32.gmra.mxu2 %v1274_v17  ;;  %v1254_v43 = vsel %vm1251_vm15, %v1253_v58, %v1249_v33 }
 0x173   : > { %v1267_v45 = vmul.f32 %v1254_v43, %v3090_v37 }
 0x174   : > { %v996_v30 = vpop.f32.mrf.mxu2  ;;  %v1022_v3 = vpop.f32.mrf.mxu3 }
 0x175   : > { %v1023_v34 = vadd.f32 %v1022_v3, %v996_v30  ;;  %v947_v2 = vpop.f32.mrf.mxu0  ;;  %v973_v24 = vpop.f32.mrf.mxu1 }
 0x176   : > { %v974_v32 = vadd.f32 %v973_v24, %v947_v2  ;;  %v1285_v2 = vld [vmem:[#allocation2 + $0x20] sm:$0xff] }
 0x177   : > { %v1275_v50 = vmul.f32 %v1263_v36, %v1023_v34  ;;  %1566 = vmatmul.f32.gmra.mxu1 %v3213_v63 }
 0x178   : > { %v1278_v35 = vmul.f32 %v1266_v31, %v974_v32 }
 0x179   : > { %1511 = vmatmul.f32.gmra.mxu3 %v1275_v50 }
 0x17a   : > { %1488 = vmatmul.f32.gmra.mxu2 %v1278_v35 }
 0x17c   : > { %v999_v26 = vpop.f32.mrf.mxu2  ;;  %v1025_v47 = vpop.f32.mrf.mxu3 }
 0x17d   : > { %v1026_v14 = vadd.f32 %v1025_v47, %v999_v26 }
 0x17f   : > { %v1279_v10 = vmul.f32 %v1267_v45, %v1026_v14 }
 0x181   : > { %1514 = vmatmul.f32.gmra.mxu3 %v1279_v10 }
 0x182   : > { %1586 = vmatmul.f32.vlgmr.msrb.gmra.mxu2 %v3278_v27 }
 0x189   : > { %1612 = vmatmul.f32.vlgmr.msrb.gmra.mxu3 %v1271_v48 }
 0x18a   : > { %1589 = vmatmul.f32.gmra.mxu2 %v1274_v17 }
 0x191   : > { %1615 = vmatmul.f32.gmra.mxu3 %v1275_v50 }
 0x192   : > { %1592 = vmatmul.f32.gmra.mxu2 %v1278_v35 }
 0x199   : > { %1618 = vmatmul.f32.gmra.mxu3 %v1279_v10 }
 0x1c1   : > { %v1431_v63 = vpop.f32.mrf.mxu0 }
 0x1c8   : > { %v1457_v19 = vpop.f32.mrf.mxu1 }
 0x1c9   : > { %v1458_v39 = vadd.f32 %v1457_v19, %v1431_v63 }
 0x1cb   : > { %v1434_v46 = vpop.f32.mrf.mxu0 }
 0x1d2   : > { %v1460_v20 = vpop.f32.mrf.mxu1 }
 0x1d3   : > { %v1461_v40 = vadd.f32 %v1460_v20, %v1434_v46 }
 0x1d5   : > { %v1437_v27 = vpop.f32.mrf.mxu0 }
 0x1dc   : > { %v1463_v23 = vpop.f32.mrf.mxu1 }
 0x1dd   : > { %v1464_v53 = vadd.f32 %v1463_v23, %v1437_v27  ;;  %v1535_v42 = vpop.f32.mrf.mxu0 }
 0x1e4   : > { %v1561_v41 = vpop.f32.mrf.mxu1 }
 0x1e5   : > { %v1562_v6 = vadd.f32 %v1561_v41, %v1535_v42  ;;  %v1538_v8 = vpop.f32.mrf.mxu0 }
 0x1ec   : > { %v1564_v7 = vpop.f32.mrf.mxu1 }
 0x1ed   : > { %v1483_v15 = vpop.f32.mrf.mxu2  ;;  %v1565_v17 = vadd.f32 %v1564_v7, %v1538_v8  ;;  %v1541_v30 = vpop.f32.mrf.mxu0 }
 0x1ee   : > { %v1484_v49 = vadd.f32 %v1483_v15, %v1458_v39 }
 0x1f4   : > { %v1509_v9 = vpop.f32.mrf.mxu3  ;;  %v1567_v44 = vpop.f32.mrf.mxu1 }
 0x1f5   : > { %v1510_v37 = vadd.f32 %v1509_v9, %v1484_v49  ;;  %v1486_v61 = vpop.f32.mrf.mxu2  ;;  %v1568_v36 = vadd.f32 %v1567_v44, %v1541_v30 }
 0x1f6   : > { %v1487_v28 = vadd.f32 %v1486_v61, %v1461_v40 }
 0x1f7   : > { %v1622_v51 = vadd.f32 %v1510_v37, %v1280_v55 }
 0x1f9   : > { %1628 = vst [vmem:[#allocation2 + $0x28] sm:$0xff] %v1622_v51 }
 0x1fc   : > { %v1512_v52 = vpop.f32.mrf.mxu3 }
 0x1fd   : > { %v1513_v25 = vadd.f32 %v1512_v52, %v1487_v28  ;;  %v1489_v29 = vpop.f32.mrf.mxu2 }
 0x1fe   : > { %v1490_v12 = vadd.f32 %v1489_v29, %v1464_v53 }
 0x1ff   : > { %v1624_v56 = vadd.f32 %v1513_v25, %v1282_v22 }
 0x201   : > { %1630 = vst [vmem:[#allocation2 + $0x8] sm:$0xff] %v1624_v56 }
 0x204   : > { %v1515_v0 = vpop.f32.mrf.mxu3 }
 0x205   : > { %v1516_v4 = vadd.f32 %v1515_v0, %v1490_v12  ;;  %v1587_v5 = vpop.f32.mrf.mxu2 }
 0x206   : > { %v1588_v54 = vadd.f32 %v1587_v5, %v1562_v6 }
 0x207   : > { %v1626_v59 = vadd.f32 %v1516_v4, %v1284_v62 }
 0x209   : > { %1632 = vst [vmem:[#allocation2 + $0x18] sm:$0xff] %v1626_v59 }
 0x20c   : > { %v1613_v13 = vpop.f32.mrf.mxu3 }
 0x20d   : > { %v1614_v11 = vadd.f32 %v1613_v13, %v1588_v54  ;;  %v1590_v48 = vpop.f32.mrf.mxu2 }
 0x20e   : > { %v1591_v38 = vadd.f32 %v1590_v48, %v1565_v17 }
 0x20f   : > { %v1623_v16 = vadd.f32 %v1614_v11, %v1281_v57 }
 0x211   : > { %1629 = vst [vmem:[#allocation2 + $0x10] sm:$0xff] %v1623_v16 }
 0x214   : > { %v1616_v21 = vpop.f32.mrf.mxu3 }
 0x215   : > { %v1617_v18 = vadd.f32 %v1616_v21, %v1591_v38  ;;  %v1593_v3 = vpop.f32.mrf.mxu2 }
 0x216   : > { %v1594_v34 = vadd.f32 %v1593_v3, %v1568_v36 }
 0x217   : > { %v1625_v1 = vadd.f32 %v1617_v18, %v1283_v60 }
 0x219   : > { %1631 = vst [vmem:[#allocation2] sm:$0xff] %v1625_v1 }
 0x21c   : > { %v1619_v24 = vpop.f32.mrf.mxu3 }
 0x21d   : > { %v1620_v31 = vadd.f32 %v1619_v24, %v1594_v34  ;;  %1637 = sbr.rel (%p1815_p5) target bundleno = 554 (0x22a), region = 60 }
 0x21f   : > { %v1627_v58 = vadd.f32 %v1620_v31, %v1285_v2 }
 0x221   : > { %1633 = vst [vmem:[#allocation2 + $0x20] sm:$0xff] %v1627_v58 }
 0x222   : > { %v1638_v32 = vld [vmem:[#allocation2 + $0x28] sm:$0xff]  ;;  %v1639_v33 = vld [vmem:[#allocation2 + $0x10] sm:$0xff]  ;;  %v1641_v35 = vld [vmem:[#allocation2] sm:$0xff] }
 0x223   : > { %v1640_v50 = vld [vmem:[#allocation2 + $0x8] sm:$0xff]  ;;  %1644 = vst [vmem:[#allocation11] sm:$0xff] %v1638_v32  ;;  %v1642_v43 = vld [vmem:[#allocation2 + $0x18] sm:$0xff] }
 0x224   : > { %1645 = vst [vmem:[#allocation11 + $0x8] sm:$0xff] %v1639_v33 }
 0x225   : > { %1646 = vst [vmem:[#allocation11 + $0x10] sm:$0xff] %v1640_v50 }
 0x226   : > { %1647 = vst [vmem:[#allocation11 + $0x18] sm:$0xff] %v1641_v35 }
 0x227   : > { %1648 = vst [vmem:[#allocation11 + $0x20] sm:$0xff] %v1642_v43 }
 0x228   : > { %v1643_v26 = vld [vmem:[#allocation2 + $0x20] sm:$0xff] }
 0x229   : > { %1649 = vst [vmem:[#allocation11 + $0x28] sm:$0xff] %v1643_v26 }
 0x22a PF: > { %p1854_p6 = scmp.eq.s32.totalorder %s2364_s6, 1  ;;  %s3431_s11 = sld [smem:[#allocation25_spill]] }
 0x22b   : > { %s2233_s7 = smov [#allocation11]   ;;  %s2234_s15 = smov 256  }
 0x22c   : > { %s1659_s9 = sshll.u32 %s2233_s7, 4  ;;  %s2235_s13 = smov 16   ;;  %s1660_s9 = int_to_ptr.vmem [resolvable:$true] %s1659_s9 }
 0x230   : > { %s1661_s21 = sshll.u32 %s3431_s11, 4  ;;  %s1662_s21 = int_to_ptr.hbm [resolvable:$true] %s1661_s21 }
 0x231   : > { %1834 = dma.vmem_to_hbm [thread:$0]  (%p1854_p6), %s1660_s9, 768, %s1662_s21, [#allocation5], %s2234_s15, %s2234_s15, %s2235_s13  }
 0x232   : > { %2187 = dma.done.wait (%p1854_p6), [#allocation5], 768  }
 0x233   : > { %2189 = vsyncadd (%p1854_p6), [#allocation5], 4294966528 }
 0x234 PF: > { %s3432_s18 = sld [smem:[#allocation18_spill]]  ;;  %s3437_s15 = smov %s2196_s16 }
 0x235   : > { %s3433_s12 = sld [smem:[#allocation17_spill]]  ;;  %s3442_s21 = smov %s2220_s22 }
 0x236   : > { %s3434_s17 = sld [smem:[#allocation21_spill]] }
 0x237   : > { %s3435_s6 = sld [smem:[#allocation20_spill]] }
 0x238   : > { %s3436_s26 = sld [smem:[#allocation19_spill]] }
 0x23a   : > { %s22_s23 = sadd.s32 1, %s3432_s18   ;;  %s3439_s18 = smov %s2208_s19 }
 0x23b   : > { %p19_p7 = scmp.ge.s32.totalorder %s22_s23, 4   ;;  %s3438_s16 = smov %s3433_s12 }
 0x23c   : > { %s3440_s19 = smov %s2212_s20 }
 0x23d   : > { %s3441_s20 = smov %s3435_s6  ;;  %21 = sbr.rel (!%p19_p7) target bundleno = 15 (0xf), region = 112 }
 0x23e   : > { %s3443_s22 = smov %s3436_s26 }
 0x242   :  { %1678 = vsyncpa [#allocation4], 1 }
 0x243   :  { %1680 = vsyncpa [#allocation4 + $0x1], 1 }
 0x244   :  { %1681 = vsyncpa [#allocation7], 1 }
 0x245   :  { %1683 = vsyncpa [#allocation7 + $0x1], 1 }
 0x246   :  { %1684 = vsyncpa [#allocation10], 1 }
 0x247   :  { %1686 = vsyncpa [#allocation10 + $0x1], 1 }
 0x248   :  { %1687 = vsyncpa [#allocation5], 1 }
 0x249   :  { %1689 = vsyncpa [#allocation5 + $0x1], 1 }

</bundles_post_ra>
